<compile_context>
chip_gen: v7x
topology: tpu7x:2x2x1
jax: 0.10.0
libtpu: 0.0.40
codegen_flags: <defaults>
</compile_context>

<pallas_src>
import jax
import jax.numpy as jnp
from jax.experimental import pallas as pl
from jax.experimental.pallas import tpu as pltpu


def _round_up(x, m):
    return (x + m - 1) // m * m


# ----------------------------------------------------------------------------
# Fused kernel: feat_net (5x Linear->ReLU) + weight-normalized head, per batch tile
# ----------------------------------------------------------------------------
def _fused_kernel(x_ref, *refs):
    """
    x_ref              : f32 (tm, Dp)   -- cast to bf16 in-kernel (VPU filler under MXU)
    refs[0:10]         : (w, b) * 5     -- w bf16 (in_p, out_p), b f32 (1, out_p); resident
    refs[10], refs[11] : wn bf16 (Fp, Lp), bc f32 (1, Lp)  -- w_norm precomputed in wrapper
    refs[12], refs[13] : feat_out f32 (tm, Fp), class_out f32 (tm, Lp)
    """
    feat_refs = refs[:10]
    wn_ref, bc_ref = refs[10], refs[11]
    feat_out_ref, class_out_ref = refs[12], refs[13]

    h = x_ref[...].astype(jnp.bfloat16)
    h32 = None
    for i in range(0, 10, 2):
        w_ref, b_ref = feat_refs[i], feat_refs[i + 1]
        h32 = jnp.maximum(
            jnp.dot(h, w_ref[...], preferred_element_type=jnp.float32) + b_ref[...],
            0.0)
        h = h32.astype(jnp.bfloat16)

    feat_out_ref[...] = h32                                         # f32 features
    class_out_ref[...] = (jnp.dot(h, wn_ref[...],
                                  preferred_element_type=jnp.float32) + bc_ref[...])
    # TODO(synk): WN_Linear init_mode=True (data-dependent re-init of weight_scale/bias,
    # mutating parameters) is a training-time side effect and is not implemented here.


# ----------------------------------------------------------------------------
# pallas_call builder
# ----------------------------------------------------------------------------
def _build_pallas_call(Bp, Dp, Fp, Lp, tm, param_shapes, flops, bytes_accessed):
    in_specs = [pl.BlockSpec((tm, Dp), lambda i: (i, 0))]                 # x tiled over batch
    in_specs += [pl.BlockSpec(s, lambda i: (0, 0)) for s in param_shapes]  # weights resident
    return pl.pallas_call(
        _fused_kernel,
        out_shape=(jax.ShapeDtypeStruct((Bp, Fp), jnp.float32),
                   jax.ShapeDtypeStruct((Bp, Lp), jnp.float32)),
        grid_spec=pltpu.PrefetchScalarGridSpec(
            num_scalar_prefetch=0,
            grid=(Bp // tm,),
            in_specs=in_specs,
            out_specs=[pl.BlockSpec((tm, Fp), lambda i: (i, 0)),
                       pl.BlockSpec((tm, Lp), lambda i: (i, 0))],
        ),
        compiler_params=pltpu.CompilerParams(
            dimension_semantics=("parallel",),
            vmem_limit_bytes=64 * 1024 * 1024),
        cost_estimate=pl.CostEstimate(
            flops=flops, transcendentals=0, bytes_accessed=bytes_accessed),
    )


# ----------------------------------------------------------------------------
# Parameter construction (torch layout) and kernel-ready preparation
# ----------------------------------------------------------------------------
def init_raw_params(key, input_size, feature_size, num_label):
    """Synthetic parameters in torch layout: weight (out, in), bias (out,)."""
    dims = (input_size, 1000, 500, 250, 250, feature_size)
    keys = jax.random.split(key, 6)
    feat = []
    for i in range(5):
        fan_in, fan_out = dims[i], dims[i + 1]
        w = jax.random.normal(keys[i], (fan_out, fan_in), jnp.float32) / jnp.sqrt(fan_in)
        b = jnp.zeros((fan_out,), jnp.float32)
        feat.append((w, b))
    wc = 0.1 * jax.random.normal(keys[5], (num_label, feature_size), jnp.float32)
    sc = jnp.ones((num_label,), jnp.float32)     # weight_scale
    bc = jnp.zeros((num_label,), jnp.float32)
    return feat, (wc, sc, bc)


def _pad2d(a, rows, cols):
    return jnp.pad(a, ((0, rows - a.shape[0]), (0, cols - a.shape[1])))


def prepare_params(raw):
    """Transpose to (in, out), zero-pad feature dims to multiples of 128, bf16-cast
    the MXU feeds.  Also precomputes the weight-normalized head matrix (x-independent,
    hoisted out of the kernel).  Zero padding is exact: padded inputs/biases are 0 and
    ReLU(0)=0 propagates zeros."""
    feat_raw, (wc, sc, bc) = raw
    feat_params = []
    for w, b in feat_raw:
        out_f, in_f = w.shape
        in_p, out_p = _round_up(in_f, 128), _round_up(out_f, 128)
        feat_params.append(_pad2d(w.T, in_p, out_p).astype(jnp.bfloat16))   # (in_p, out_p)
        feat_params.append(_pad2d(b[None, :], 1, out_p))                    # f32 (1, out_p)
    num_label, feature_size = wc.shape
    Fp, Lp = _round_up(feature_size, 128), _round_up(num_label, 128)
    # WN_Linear eval path: w_norm = w * scale / sqrt(sum(w^2, dim=1) + 1e-6)
    norm = jnp.sqrt(jnp.sum(wc * wc, axis=1, keepdims=True) + 1e-6)         # (L, 1)
    w_norm = wc * (sc[:, None] / norm)                                      # (L, F) f32
    head_params = (
        _pad2d(w_norm.T, Fp, Lp).astype(jnp.bfloat16),   # (Fp, Lp) bf16 MXU feed
        _pad2d(bc[None, :], 1, Lp),                      # (1, Lp) f32
    )
    return tuple(feat_params), head_params


# ----------------------------------------------------------------------------
# Batch tile selection: as large as possible (per-step overhead amortization),
# but keep grid >= 2 when B allows so both v7x TensorCores get work.
# ----------------------------------------------------------------------------
def _choose_tm(B):
    if B <= 128:
        return _round_up(max(B, 1), 16)
    tm = 1024
    while tm > 128 and B < 2 * tm:
        tm //= 2
    return tm


# ----------------------------------------------------------------------------
# Forward wrapper (mirrors Discriminator.forward; 'both' returns (feat, class))
# ----------------------------------------------------------------------------
def discriminator_forward(X, prepared, dims, require="class"):
    input_size, feature_size, num_label = dims
    feat_params, (wn, bc) = prepared

    if X.ndim == 4:                       # X.view(X.size(0), -1)
        X = X.reshape(X.shape[0], -1)
    B, D = X.shape
    assert D == input_size

    Dp = feat_params[0].shape[0]
    Fp, Lp = wn.shape
    tm = _choose_tm(B)
    Bp = _round_up(B, tm)

    x = X.astype(jnp.float32)
    if (Bp, Dp) != (B, D):                # pad only when actually needed
        x = jnp.pad(x, ((0, Bp - B), (0, Dp - D)))

    params = feat_params + (wn, bc)
    weights = feat_params[0::2] + (wn,)
    flops = 2 * Bp * sum(w.shape[0] * w.shape[1] for w in weights)
    bytes_accessed = (x.size * x.dtype.itemsize
                      + sum(p.size * p.dtype.itemsize for p in params)
                      + Bp * (Fp + Lp) * 4)

    call = _build_pallas_call(Bp, Dp, Fp, Lp, tm,
                              [p.shape for p in params], flops, bytes_accessed)
    feat_out, class_out = call(x, *params)

    feat = feat_out[:B, :feature_size]
    cls = class_out[:B, :num_label]
    if require == "feat":
        return feat
    if require == "class":
        return cls
    if require == "both":
        return feat, cls
    raise ValueError(require)


# ----------------------------------------------------------------------------
# Pure-JAX references
# ----------------------------------------------------------------------------
def reference_forward_f32(X, raw, require="class"):
    """Faithful f32 re-implementation of the torch module."""
    feat_raw, (wc, sc, bc) = raw
    if X.ndim == 4:
        X = X.reshape(X.shape[0], -1)
    h = X
    for w, b in feat_raw:
        h = jnp.maximum(h @ w.T + b, 0.0)
    if require == "feat":
        return h
    norm = jnp.sqrt(jnp.sum(wc * wc, axis=1, keepdims=True) + 1e-6)
    w_norm = wc * (sc[:, None] / norm)
    return h @ w_norm.T + bc


def reference_forward_prepared(X, prepared, dims):
    """Reference using the exact prepared (padded / bf16) params the kernel sees."""
    input_size, feature_size, num_label = dims
    feat_params, (wn, bc) = prepared
    if X.ndim == 4:
        X = X.reshape(X.shape[0], -1)
    Dp = feat_params[0].shape[0]
    x = jnp.pad(X.astype(jnp.float32), ((0, 0), (0, Dp - X.shape[1])))
    h = x.astype(jnp.bfloat16)
    h32 = None
    for i in range(0, len(feat_params), 2):
        w, b = feat_params[i], feat_params[i + 1]
        h32 = jnp.maximum(jnp.dot(h, w, preferred_element_type=jnp.float32) + b, 0.0)
        h = h32.astype(jnp.bfloat16)
    cls = jnp.dot(h, wn, preferred_element_type=jnp.float32) + bc
    return h32[:, :feature_size], cls[:, :num_label]


# ----------------------------------------------------------------------------
if __name__ == "__main__":
    key = jax.random.PRNGKey(0)
    kx, kp = jax.random.split(key)

    # Small shapes consistent with the module: input_size = image_size**2 (1 channel).
    B, C, image_size = 2, 1, 16
    input_size = image_size * image_size          # 256 == C*H*W
    feature_size = 100
    num_label = 10
    dims = (input_size, feature_size, num_label)

    X = jax.random.normal(kx, (B, C, image_size, image_size), jnp.float32)
    raw = init_raw_params(kp, input_size, feature_size, num_label)
    prepared = prepare_params(raw)

    # Fused path: one pallas_call produces both outputs.
    out_feat, out_class = discriminator_forward(X, prepared, dims, require="both")
    # Individual 'require' path (same fused kernel; wrapper selects the output).
    out_class_only = discriminator_forward(X, prepared, dims, require="class")
    jax.block_until_ready((out_feat, out_class, out_class_only))

    assert out_class.shape == (B, num_label)
    assert out_feat.shape == (B, feature_size)
    assert jnp.allclose(out_class, out_class_only)

    # Exact-math check (same bf16 weights / f32 accumulation as the kernel).
    ref_f, ref_c = reference_forward_prepared(X, prepared, dims)
    assert jnp.allclose(out_feat, ref_f, rtol=2e-3, atol=1e-3)
    assert jnp.allclose(out_class, ref_c, rtol=2e-3, atol=1e-3)

    # Semantic check vs the full-f32 torch-faithful reference (bf16 weight tolerance).
    ref_f32 = reference_forward_f32(X, raw, "feat")
    ref_c32 = reference_forward_f32(X, raw, "class")
    assert jnp.allclose(out_feat, ref_f32, rtol=5e-2, atol=5e-3)
    assert jnp.allclose(out_class, ref_c32, rtol=5e-2, atol=5e-3)

    print("KERNEL_OK")
</pallas_src>

<mosaic_0001>
module attributes {stable_mosaic.version = 11 : i64} {
  func.func @_fused_kernel(%arg0: i32, %arg1: memref<16x256xf32, #tpu.memory_space<vmem>>, %arg2: memref<256x1024xbf16, #tpu.memory_space<vmem>>, %arg3: memref<1x1024xf32, #tpu.memory_space<vmem>>, %arg4: memref<1024x512xbf16, #tpu.memory_space<vmem>>, %arg5: memref<1x512xf32, #tpu.memory_space<vmem>>, %arg6: memref<512x256xbf16, #tpu.memory_space<vmem>>, %arg7: memref<1x256xf32, #tpu.memory_space<vmem>>, %arg8: memref<256x256xbf16, #tpu.memory_space<vmem>>, %arg9: memref<1x256xf32, #tpu.memory_space<vmem>>, %arg10: memref<256x128xbf16, #tpu.memory_space<vmem>>, %arg11: memref<1x128xf32, #tpu.memory_space<vmem>>, %arg12: memref<128x128xbf16, #tpu.memory_space<vmem>>, %arg13: memref<1x128xf32, #tpu.memory_space<vmem>>, %arg14: memref<16x128xf32, #tpu.memory_space<vmem>>, %arg15: memref<16x128xf32, #tpu.memory_space<vmem>>) attributes {dimension_semantics = [#tpu.dimension_semantics<parallel>], iteration_bounds = array<i64: 1>, scalar_prefetch = 0 : i64, scratch_operands = 0 : i64, tpu.core_type = #tpu.core_type<tc>, window_params = [{transform_indices = @transform_0, window_bounds = array<i64: 16, 256>}, {pipeline_mode = #tpu.pipeline_mode<synchronous>, transform_indices = @transform_1, window_bounds = array<i64: 256, 1024>}, {pipeline_mode = #tpu.pipeline_mode<synchronous>, transform_indices = @transform_2, window_bounds = array<i64: 1, 1024>}, {pipeline_mode = #tpu.pipeline_mode<synchronous>, transform_indices = @transform_3, window_bounds = array<i64: 1024, 512>}, {pipeline_mode = #tpu.pipeline_mode<synchronous>, transform_indices = @transform_4, window_bounds = array<i64: 1, 512>}, {pipeline_mode = #tpu.pipeline_mode<synchronous>, transform_indices = @transform_5, window_bounds = array<i64: 512, 256>}, {pipeline_mode = #tpu.pipeline_mode<synchronous>, transform_indices = @transform_6, window_bounds = array<i64: 1, 256>}, {pipeline_mode = #tpu.pipeline_mode<synchronous>, transform_indices = @transform_7, window_bounds = array<i64: 256, 256>}, {pipeline_mode = #tpu.pipeline_mode<synchronous>, transform_indices = @transform_8, window_bounds = array<i64: 1, 256>}, {pipeline_mode = #tpu.pipeline_mode<synchronous>, transform_indices = @transform_9, window_bounds = array<i64: 256, 128>}, {pipeline_mode = #tpu.pipeline_mode<synchronous>, transform_indices = @transform_10, window_bounds = array<i64: 1, 128>}, {pipeline_mode = #tpu.pipeline_mode<synchronous>, transform_indices = @transform_11, window_bounds = array<i64: 128, 128>}, {pipeline_mode = #tpu.pipeline_mode<synchronous>, transform_indices = @transform_12, window_bounds = array<i64: 1, 128>}, {transform_indices = @transform_13, window_bounds = array<i64: 16, 128>}, {transform_indices = @transform_14, window_bounds = array<i64: 16, 128>}]} {
    %c0 = arith.constant 0 : index
    %c0_0 = arith.constant 0 : index
    %0 = vector.load %arg1[%c0, %c0_0] : memref<16x256xf32, #tpu.memory_space<vmem>>, vector<16x256xf32>
    %1 = arith.truncf %0 : vector<16x256xf32> to vector<16x256xbf16>
    %c0_1 = arith.constant 0 : index
    %c0_2 = arith.constant 0 : index
    %2 = vector.load %arg2[%c0_1, %c0_2] : memref<256x1024xbf16, #tpu.memory_space<vmem>>, vector<256x1024xbf16>
    %cst = arith.constant dense<0.000000e+00> : vector<16x1024xf32>
    %3 = tpu.matmul %1, %2, %cst {dimension_numbers = #tpu.dot_dimension_numbers<[1], [0], [0], [1], [0, 0, 1, 1], [], []>} : vector<16x256xbf16>, vector<256x1024xbf16>, vector<16x1024xf32> -> vector<16x1024xf32>
    %c0_3 = arith.constant 0 : index
    %c0_4 = arith.constant 0 : index
    %4 = vector.load %arg3[%c0_3, %c0_4] : memref<1x1024xf32, #tpu.memory_space<vmem>>, vector<1x1024xf32>
    %5 = vector.broadcast %4 : vector<1x1024xf32> to vector<16x1024xf32>
    %6 = arith.addf %3, %5 : vector<16x1024xf32>
    %cst_5 = arith.constant 0.000000e+00 : f32
    %7 = vector.broadcast %cst_5 : f32 to vector<16x1024xf32>
    %8 = arith.maximumf %6, %7 : vector<16x1024xf32>
    %9 = arith.truncf %8 : vector<16x1024xf32> to vector<16x1024xbf16>
    %c0_6 = arith.constant 0 : index
    %c0_7 = arith.constant 0 : index
    %10 = vector.load %arg4[%c0_6, %c0_7] : memref<1024x512xbf16, #tpu.memory_space<vmem>>, vector<1024x512xbf16>
    %cst_8 = arith.constant dense<0.000000e+00> : vector<16x512xf32>
    %11 = tpu.matmul %9, %10, %cst_8 {dimension_numbers = #tpu.dot_dimension_numbers<[1], [0], [0], [1], [0, 0, 1, 1], [], []>} : vector<16x1024xbf16>, vector<1024x512xbf16>, vector<16x512xf32> -> vector<16x512xf32>
    %c0_9 = arith.constant 0 : index
    %c0_10 = arith.constant 0 : index
    %12 = vector.load %arg5[%c0_9, %c0_10] : memref<1x512xf32, #tpu.memory_space<vmem>>, vector<1x512xf32>
    %13 = vector.broadcast %12 : vector<1x512xf32> to vector<16x512xf32>
    %14 = arith.addf %11, %13 : vector<16x512xf32>
    %cst_11 = arith.constant 0.000000e+00 : f32
    %15 = vector.broadcast %cst_11 : f32 to vector<16x512xf32>
    %16 = arith.maximumf %14, %15 : vector<16x512xf32>
    %17 = arith.truncf %16 : vector<16x512xf32> to vector<16x512xbf16>
    %c0_12 = arith.constant 0 : index
    %c0_13 = arith.constant 0 : index
    %18 = vector.load %arg6[%c0_12, %c0_13] : memref<512x256xbf16, #tpu.memory_space<vmem>>, vector<512x256xbf16>
    %cst_14 = arith.constant dense<0.000000e+00> : vector<16x256xf32>
    %19 = tpu.matmul %17, %18, %cst_14 {dimension_numbers = #tpu.dot_dimension_numbers<[1], [0], [0], [1], [0, 0, 1, 1], [], []>} : vector<16x512xbf16>, vector<512x256xbf16>, vector<16x256xf32> -> vector<16x256xf32>
    %c0_15 = arith.constant 0 : index
    %c0_16 = arith.constant 0 : index
    %20 = vector.load %arg7[%c0_15, %c0_16] : memref<1x256xf32, #tpu.memory_space<vmem>>, vector<1x256xf32>
    %21 = vector.broadcast %20 : vector<1x256xf32> to vector<16x256xf32>
    %22 = arith.addf %19, %21 : vector<16x256xf32>
    %cst_17 = arith.constant 0.000000e+00 : f32
    %23 = vector.broadcast %cst_17 : f32 to vector<16x256xf32>
    %24 = arith.maximumf %22, %23 : vector<16x256xf32>
    %25 = arith.truncf %24 : vector<16x256xf32> to vector<16x256xbf16>
    %c0_18 = arith.constant 0 : index
    %c0_19 = arith.constant 0 : index
    %26 = vector.load %arg8[%c0_18, %c0_19] : memref<256x256xbf16, #tpu.memory_space<vmem>>, vector<256x256xbf16>
    %cst_20 = arith.constant dense<0.000000e+00> : vector<16x256xf32>
    %27 = tpu.matmul %25, %26, %cst_20 {dimension_numbers = #tpu.dot_dimension_numbers<[1], [0], [0], [1], [0, 0, 1, 1], [], []>} : vector<16x256xbf16>, vector<256x256xbf16>, vector<16x256xf32> -> vector<16x256xf32>
    %c0_21 = arith.constant 0 : index
    %c0_22 = arith.constant 0 : index
    %28 = vector.load %arg9[%c0_21, %c0_22] : memref<1x256xf32, #tpu.memory_space<vmem>>, vector<1x256xf32>
    %29 = vector.broadcast %28 : vector<1x256xf32> to vector<16x256xf32>
    %30 = arith.addf %27, %29 : vector<16x256xf32>
    %cst_23 = arith.constant 0.000000e+00 : f32
    %31 = vector.broadcast %cst_23 : f32 to vector<16x256xf32>
    %32 = arith.maximumf %30, %31 : vector<16x256xf32>
    %33 = arith.truncf %32 : vector<16x256xf32> to vector<16x256xbf16>
    %c0_24 = arith.constant 0 : index
    %c0_25 = arith.constant 0 : index
    %34 = vector.load %arg10[%c0_24, %c0_25] : memref<256x128xbf16, #tpu.memory_space<vmem>>, vector<256x128xbf16>
    %cst_26 = arith.constant dense<0.000000e+00> : vector<16x128xf32>
    %35 = tpu.matmul %33, %34, %cst_26 {dimension_numbers = #tpu.dot_dimension_numbers<[1], [0], [0], [1], [0, 0, 1, 1], [], []>} : vector<16x256xbf16>, vector<256x128xbf16>, vector<16x128xf32> -> vector<16x128xf32>
    %c0_27 = arith.constant 0 : index
    %c0_28 = arith.constant 0 : index
    %36 = vector.load %arg11[%c0_27, %c0_28] : memref<1x128xf32, #tpu.memory_space<vmem>>, vector<1x128xf32>
    %37 = vector.broadcast %36 : vector<1x128xf32> to vector<16x128xf32>
    %38 = arith.addf %35, %37 : vector<16x128xf32>
    %cst_29 = arith.constant 0.000000e+00 : f32
    %39 = vector.broadcast %cst_29 : f32 to vector<16x128xf32>
    %40 = arith.maximumf %38, %39 : vector<16x128xf32>
    %41 = arith.truncf %40 : vector<16x128xf32> to vector<16x128xbf16>
    %c0_30 = arith.constant 0 : index
    %c0_31 = arith.constant 0 : index
    %42 = vector.load %arg14[%c0_30, %c0_31] : memref<16x128xf32, #tpu.memory_space<vmem>>, vector<16x128xf32>
    tpu.vector_store %arg14[%c0_30, %c0_31], %40 {strides = array<i32>} : memref<16x128xf32, #tpu.memory_space<vmem>>, vector<16x128xf32>,
    %c0_32 = arith.constant 0 : index
    %c0_33 = arith.constant 0 : index
    %43 = vector.load %arg12[%c0_32, %c0_33] : memref<128x128xbf16, #tpu.memory_space<vmem>>, vector<128x128xbf16>
    %cst_34 = arith.constant dense<0.000000e+00> : vector<16x128xf32>
    %44 = tpu.matmul %41, %43, %cst_34 {dimension_numbers = #tpu.dot_dimension_numbers<[1], [0], [0], [1], [0, 0, 1, 1], [], []>} : vector<16x128xbf16>, vector<128x128xbf16>, vector<16x128xf32> -> vector<16x128xf32>
    %c0_35 = arith.constant 0 : index
    %c0_36 = arith.constant 0 : index
    %45 = vector.load %arg13[%c0_35, %c0_36] : memref<1x128xf32, #tpu.memory_space<vmem>>, vector<1x128xf32>
    %46 = vector.broadcast %45 : vector<1x128xf32> to vector<16x128xf32>
    %47 = arith.addf %44, %46 : vector<16x128xf32>
    %c0_37 = arith.constant 0 : index
    %c0_38 = arith.constant 0 : index
    %48 = vector.load %arg15[%c0_37, %c0_38] : memref<16x128xf32, #tpu.memory_space<vmem>>, vector<16x128xf32>
    tpu.vector_store %arg15[%c0_37, %c0_38], %47 {strides = array<i32>} : memref<16x128xf32, #tpu.memory_space<vmem>>, vector<16x128xf32>,
    return
  }
  func.func @transform_0(%arg0: i32) -> (i32, i32) {
    %c0_i32 = arith.constant 0 : i32
    %c0_i32_0 = arith.constant 0 : i32
    return %arg0, %c0_i32 : i32, i32
  }
  func.func @transform_1(%arg0: i32) -> (i32, i32) {
    %c0_i32 = arith.constant 0 : i32
    %c0_i32_0 = arith.constant 0 : i32
    %c0_i32_1 = arith.constant 0 : i32
    return %c0_i32, %c0_i32_0 : i32, i32
  }
  func.func @transform_2(%arg0: i32) -> (i32, i32) {
    %c0_i32 = arith.constant 0 : i32
    %c0_i32_0 = arith.constant 0 : i32
    %c0_i32_1 = arith.constant 0 : i32
    return %c0_i32, %c0_i32_0 : i32, i32
  }
  func.func @transform_3(%arg0: i32) -> (i32, i32) {
    %c0_i32 = arith.constant 0 : i32
    %c0_i32_0 = arith.constant 0 : i32
    %c0_i32_1 = arith.constant 0 : i32
    return %c0_i32, %c0_i32_0 : i32, i32
  }
  func.func @transform_4(%arg0: i32) -> (i32, i32) {
    %c0_i32 = arith.constant 0 : i32
    %c0_i32_0 = arith.constant 0 : i32
    %c0_i32_1 = arith.constant 0 : i32
    return %c0_i32, %c0_i32_0 : i32, i32
  }
  func.func @transform_5(%arg0: i32) -> (i32, i32) {
    %c0_i32 = arith.constant 0 : i32
    %c0_i32_0 = arith.constant 0 : i32
    %c0_i32_1 = arith.constant 0 : i32
    return %c0_i32, %c0_i32_0 : i32, i32
  }
  func.func @transform_6(%arg0: i32) -> (i32, i32) {
    %c0_i32 = arith.constant 0 : i32
    %c0_i32_0 = arith.constant 0 : i32
    %c0_i32_1 = arith.constant 0 : i32
    return %c0_i32, %c0_i32_0 : i32, i32
  }
  func.func @transform_7(%arg0: i32) -> (i32, i32) {
    %c0_i32 = arith.constant 0 : i32
    %c0_i32_0 = arith.constant 0 : i32
    %c0_i32_1 = arith.constant 0 : i32
    return %c0_i32, %c0_i32_0 : i32, i32
  }
  func.func @transform_8(%arg0: i32) -> (i32, i32) {
    %c0_i32 = arith.constant 0 : i32
    %c0_i32_0 = arith.constant 0 : i32
    %c0_i32_1 = arith.constant 0 : i32
    return %c0_i32, %c0_i32_0 : i32, i32
  }
  func.func @transform_9(%arg0: i32) -> (i32, i32) {
    %c0_i32 = arith.constant 0 : i32
    %c0_i32_0 = arith.constant 0 : i32
    %c0_i32_1 = arith.constant 0 : i32
    return %c0_i32, %c0_i32_0 : i32, i32
  }
  func.func @transform_10(%arg0: i32) -> (i32, i32) {
    %c0_i32 = arith.constant 0 : i32
    %c0_i32_0 = arith.constant 0 : i32
    %c0_i32_1 = arith.constant 0 : i32
    return %c0_i32, %c0_i32_0 : i32, i32
  }
  func.func @transform_11(%arg0: i32) -> (i32, i32) {
    %c0_i32 = arith.constant 0 : i32
    %c0_i32_0 = arith.constant 0 : i32
    %c0_i32_1 = arith.constant 0 : i32
    return %c0_i32, %c0_i32_0 : i32, i32
  }
  func.func @transform_12(%arg0: i32) -> (i32, i32) {
    %c0_i32 = arith.constant 0 : i32
    %c0_i32_0 = arith.constant 0 : i32
    %c0_i32_1 = arith.constant 0 : i32
    return %c0_i32, %c0_i32_0 : i32, i32
  }
  func.func @transform_13(%arg0: i32) -> (i32, i32) {
    %c0_i32 = arith.constant 0 : i32
    %c0_i32_0 = arith.constant 0 : i32
    return %arg0, %c0_i32 : i32, i32
  }
  func.func @transform_14(%arg0: i32) -> (i32, i32) {
    %c0_i32 = arith.constant 0 : i32
    %c0_i32_0 = arith.constant 0 : i32
    return %arg0, %c0_i32 : i32, i32
  }
}

</mosaic_0001>

<bundles_post_ra>
// kernel: tpu_custom_call.1
= control target key start
LH: loop header
LB: loop body
LE: loop exit
PB: predicated region body
PF: predicated region fallthrough
CT: control target
= control target key end

     0   :  { %20 = vsyncpa [#allocation3], 0  ;;  %s6105_s0 = inlined_call_operand.hbm [shape: f32[16,256], index: 0, kind: input, shape index: {}]   ;;  %s6106_s1 = inlined_call_operand.hbm [shape: bf16[256,1024], index: 1, kind: input, shape index: {}]   ;;  %s6107_s2 = inlined_call_operand.hbm [shape: f32[1,1024], index: 2, kind: input, shape index: {}]   ;;  %s6108_s3 = inlined_call_operand.hbm [shape: bf16[1024,512], index: 3, kind: input, shape index: {}]   ;;  %s6109_s4 = inlined_call_operand.hbm [shape: f32[1,512], index: 4, kind: input, shape index: {}]   ;;  %s6110_s5 = inlined_call_operand.hbm [shape: bf16[512,256], index: 5, kind: input, shape index: {}]   ;;  %s6111_s6 = inlined_call_operand.hbm [shape: f32[1,256], index: 6, kind: input, shape index: {}]   ;;  %s6112_s7 = inlined_call_operand.hbm [shape: bf16[256,256], index: 7, kind: input, shape index: {}]   ;;  %s6113_s8 = inlined_call_operand.hbm [shape: f32[1,256], index: 8, kind: input, shape index: {}]   ;;  %s6114_s9 = inlined_call_operand.hbm [shape: bf16[256,128], index: 9, kind: input, shape index: {}]   ;;  %s6115_s10 = inlined_call_operand.hbm [shape: f32[1,128], index: 10, kind: input, shape index: {}]   ;;  %s6116_s11 = inlined_call_operand.hbm [shape: bf16[128,128], index: 11, kind: input, shape index: {}]   ;;  %s6117_s12 = inlined_call_operand.hbm [shape: f32[1,128], index: 12, kind: input, shape index: {}]   ;;  %s6118_s13 = inlined_call_operand.hbm [shape: f32[16,128], index: 13, kind: output, shape index: {0}]   ;;  %s6119_s14 = inlined_call_operand.hbm [shape: f32[16,128], index: 14, kind: output, shape index: {1}]  }
   0x1   :  { %21 = vsyncpa [#allocation6], 0 }
   0x2   :  { %22 = vsyncpa [#allocation9], 0 }
   0x3   :  { %23 = vsyncpa [#allocation12], 0 }
   0x4   :  { %24 = vsyncpa [#allocation15], 0 }
   0x5   :  { %25 = vsyncpa [#allocation18], 0 }
   0x6   :  { %26 = vsyncpa [#allocation21], 0 }
   0x7   :  { %27 = vsyncpa [#allocation4], 0 }
   0x8   :  { %28 = vsyncpa [#allocation25], 0  ;;  %s5736_s29 = smov [#allocation5]   ;;  %s5388_s17 = scalar_lea.hbm %s6106_s1, 16384 }
   0x9   :  { %s46_s30 = sshll.u32 %s5736_s29, 4  ;;  %p5389_p0 = scmp.ne.s32.totalorder %s6106_s1, %s5388_s17  ;;  %s47_s30 = int_to_ptr.vmem [resolvable:$true] %s46_s30 }
   0xa   :  { %p5392_p1 = scmp.lt.u32.totalorder %s5388_s17, %s6106_s1 }
   0xc   :  { %p5394_p2 = pnand %p5392_p1, %p5389_p0 }
   0xe   :  { %5397 = shalt.err (!%p5394_p2)
}
   0xf   :  { %s5398_s22 = scalar_lea.vmem %s47_s30, 16384  ;;  %p5403_p4 = scmp.lt.s32.totalorder %s47_s30, %s47_s30 }
  0x10   :  { %p5399_p3 = scmp.ne.s32.totalorder %s47_s30, %s5398_s22  ;;  %p5404_p5 = scmp.lt.s32.totalorder %s5398_s22, %s5398_s22 }
  0x12   :  { %p5405_p6 = por %p5404_p5, %p5403_p4 }
  0x14   :  { %p5406_p7 = pnand %p5405_p6, %p5399_p3 }
  0x16   :  { %5409 = shalt.err (!%p5406_p7)
}
  0x17   :  { %s5737_s23 = smov 512   ;;  %s5738_s24 = smov 32  }
  0x18   :  { %52 = dma.hbm_to_vmem [thread:$0]  %s6106_s1, 16384, %s47_s30, [#allocation6], %s5737_s23, %s5737_s23, %s5738_s24  }
  0x19   :  { %s5739_s27 = smov [#allocation8]   ;;  %s5740_s29 = smov [#allocation11]  }
  0x1a   :  { %s68_s28 = sshll.u32 %s5739_s27, 4  ;;  %s90_s15 = sshll.u32 %s5740_s29, 4  ;;  %s69_s28 = int_to_ptr.vmem [resolvable:$true] %s68_s28  ;;  %s91_s15 = int_to_ptr.vmem [resolvable:$true] %s90_s15 }
  0x1b   :  { %s5410_s18 = scalar_lea.hbm %s6108_s3, 32768 }
  0x1c   :  { %p5411_p8 = scmp.ne.s32.totalorder %s6108_s3, %s5410_s18  ;;  %p5414_p9 = scmp.lt.u32.totalorder %s5410_s18, %s6108_s3 }
  0x1e   :  { %p5416_p10 = pnand %p5414_p9, %p5411_p8 }
  0x20   :  { %5419 = shalt.err (!%p5416_p10)
}
  0x21   :  { %s5420_s1 = scalar_lea.vmem %s69_s28, 32768  ;;  %p5425_p12 = scmp.lt.s32.totalorder %s69_s28, %s69_s28 }
  0x22   :  { %p5421_p11 = scmp.ne.s32.totalorder %s69_s28, %s5420_s1  ;;  %p5426_p13 = scmp.lt.s32.totalorder %s5420_s1, %s5420_s1 }
  0x24   :  { %p5427_p0 = por %p5426_p13, %p5425_p12 }
  0x26   :  { %p5428_p1 = pnand %p5427_p0, %p5421_p11 }
  0x28   :  { %5431 = shalt.err (!%p5428_p1)
}
  0x29   :  { %s5741_s30 = smov 256   ;;  %s5742_s23 = smov 16  }
  0x2a   :  { %74 = dma.hbm_to_vmem [thread:$0]  %s6108_s3, 32768, %s69_s28, [#allocation9], %s5741_s30, %s5741_s30, %s5742_s23  }
  0x2b   :  { %s5432_s29 = scalar_lea.hbm %s6110_s5, 8192 }
  0x2c   :  { %p5433_p2 = scmp.ne.s32.totalorder %s6110_s5, %s5432_s29  ;;  %p5436_p3 = scmp.lt.u32.totalorder %s5432_s29, %s6110_s5 }
  0x2e   :  { %p5438_p4 = pnand %p5436_p3, %p5433_p2 }
  0x30   :  { %5441 = shalt.err (!%p5438_p4)
}
  0x31   :  { %s5442_s20 = scalar_lea.vmem %s91_s15, 8192  ;;  %p5447_p6 = scmp.lt.s32.totalorder %s91_s15, %s91_s15 }
  0x32   :  { %p5443_p5 = scmp.ne.s32.totalorder %s91_s15, %s5442_s20  ;;  %p5448_p7 = scmp.lt.s32.totalorder %s5442_s20, %s5442_s20 }
  0x34   :  { %p5449_p8 = por %p5448_p7, %p5447_p6 }
  0x36   :  { %p5450_p9 = pnand %p5449_p8, %p5443_p5 }
  0x38   :  { %5453 = shalt.err (!%p5450_p9)
}
  0x39   :  { %s5743_s3 = smov 128   ;;  %s5744_s28 = smov 8  }
  0x3a   :  { %96 = dma.hbm_to_vmem [thread:$0]  %s6110_s5, 8192, %s91_s15, [#allocation12], %s5743_s3, %s5743_s3, %s5744_s28  }
  0x3b   :  { %s5745_s1 = smov [#allocation14]   ;;  %s5746_s25 = smov [#allocation17]  }
  0x3c   :  { %s112_s24 = sshll.u32 %s5745_s1, 4  ;;  %s134_s26 = sshll.u32 %s5746_s25, 4  ;;  %s113_s24 = int_to_ptr.vmem [resolvable:$true] %s112_s24  ;;  %s135_s26 = int_to_ptr.vmem [resolvable:$true] %s134_s26 }
  0x3d   :  { %s5454_s16 = scalar_lea.hbm %s6112_s7, 4096 }
  0x3e   :  { %p5455_p10 = scmp.ne.s32.totalorder %s6112_s7, %s5454_s16  ;;  %p5458_p11 = scmp.lt.u32.totalorder %s5454_s16, %s6112_s7 }
  0x40   :  { %p5460_p12 = pnand %p5458_p11, %p5455_p10 }
  0x42   :  { %5463 = shalt.err (!%p5460_p12)
}
  0x43   :  { %s5464_s5 = scalar_lea.vmem %s113_s24, 4096  ;;  %p5469_p0 = scmp.lt.s32.totalorder %s113_s24, %s113_s24 }
  0x44   :  { %p5465_p13 = scmp.ne.s32.totalorder %s113_s24, %s5464_s5  ;;  %p5470_p1 = scmp.lt.s32.totalorder %s5464_s5, %s5464_s5 }
  0x46   :  { %p5471_p2 = por %p5470_p1, %p5469_p0 }
  0x48   :  { %p5472_p3 = pnand %p5471_p2, %p5465_p13 }
  0x4a   :  { %5475 = shalt.err (!%p5472_p3)
}
  0x4b   :  { %118 = dma.hbm_to_vmem [thread:$0]  %s6112_s7, 4096, %s113_s24, [#allocation15], %s5743_s3, %s5743_s3, %s5744_s28  }
  0x4c   :  { %s5476_s25 = scalar_lea.hbm %s6114_s9, 2048 }
  0x4d   :  { %p5477_p4 = scmp.ne.s32.totalorder %s6114_s9, %s5476_s25  ;;  %p5480_p5 = scmp.lt.u32.totalorder %s5476_s25, %s6114_s9 }
  0x4f   :  { %p5482_p6 = pnand %p5480_p5, %p5477_p4 }
  0x51   :  { %5485 = shalt.err (!%p5482_p6)
}
  0x52   :  { %s5486_s18 = scalar_lea.vmem %s135_s26, 2048  ;;  %p5491_p8 = scmp.lt.s32.totalorder %s135_s26, %s135_s26 }
  0x53   :  { %p5487_p7 = scmp.ne.s32.totalorder %s135_s26, %s5486_s18  ;;  %p5492_p9 = scmp.lt.s32.totalorder %s5486_s18, %s5486_s18 }
  0x55   :  { %p5493_p10 = por %p5492_p9, %p5491_p8 }
  0x57   :  { %p5494_p11 = pnand %p5493_p10, %p5487_p7 }
  0x59   :  { %5497 = shalt.err (!%p5494_p11)
}
  0x5a   :  { %s5747_s7 = smov 64   ;;  %s5748_s24 = smov 4  }
  0x5b   :  { %140 = dma.hbm_to_vmem [thread:$0]  %s6114_s9, 2048, %s135_s26, [#allocation18], %s5747_s7, %s5747_s7, %s5748_s24  }
  0x5c   :  { %s5749_s5 = smov [#allocation20]   ;;  %s5750_s21 = smov [#allocation2]  }
  0x5d   :  { %s156_s15 = sshll.u32 %s5749_s5, 4  ;;  %s34_s22 = sshll.u32 %s5750_s21, 4  ;;  %s157_s15 = int_to_ptr.vmem [resolvable:$true] %s156_s15  ;;  %s35_s22 = int_to_ptr.vmem [resolvable:$true] %s34_s22 }
  0x5e   :  { %s5498_s27 = scalar_lea.hbm %s6116_s11, 1024 }
  0x5f   :  { %p5499_p12 = scmp.ne.s32.totalorder %s6116_s11, %s5498_s27  ;;  %p5502_p13 = scmp.lt.u32.totalorder %s5498_s27, %s6116_s11 }
  0x61   :  { %p5504_p0 = pnand %p5502_p13, %p5499_p12 }
  0x63   :  { %5507 = shalt.err (!%p5504_p0)
}
  0x64   :  { %s5508_s9 = scalar_lea.vmem %s157_s15, 1024  ;;  %p5513_p2 = scmp.lt.s32.totalorder %s157_s15, %s157_s15 }
  0x65   :  { %p5509_p1 = scmp.ne.s32.totalorder %s157_s15, %s5508_s9  ;;  %p5514_p3 = scmp.lt.s32.totalorder %s5508_s9, %s5508_s9 }
  0x67   :  { %p5515_p4 = por %p5514_p3, %p5513_p2 }
  0x69   :  { %p5516_p5 = pnand %p5515_p4, %p5509_p1 }
  0x6b   :  { %5519 = shalt.err (!%p5516_p5)
}
  0x6c   :  { %162 = dma.hbm_to_vmem [thread:$0]  %s6116_s11, 1024, %s157_s15, [#allocation21], %s5747_s7, %s5747_s7, %s5748_s24  }
  0x6d   :  { %s5520_s21 = scalar_lea.hbm %s6105_s0, 512 }
  0x6e   :  { %p5521_p6 = scmp.ne.s32.totalorder %s6105_s0, %s5520_s21  ;;  %p5524_p7 = scmp.lt.u32.totalorder %s5520_s21, %s6105_s0 }
  0x70   :  { %p5526_p8 = pnand %p5524_p7, %p5521_p6 }
  0x72   :  { %5529 = shalt.err (!%p5526_p8)
}
  0x73   :  { %s5530_s16 = scalar_lea.vmem %s35_s22, 512  ;;  %p5535_p10 = scmp.lt.s32.totalorder %s35_s22, %s35_s22 }
  0x74   :  { %p5531_p9 = scmp.ne.s32.totalorder %s35_s22, %s5530_s16  ;;  %p5536_p11 = scmp.lt.s32.totalorder %s5530_s16, %s5530_s16 }
  0x76   :  { %p5537_p12 = por %p5536_p11, %p5535_p10 }
  0x78   :  { %p5538_p13 = pnand %p5537_p12, %p5531_p9 }
  0x7a   :  { %5541 = shalt.err (!%p5538_p13)
}
  0x7b   :  { %40 = dma.hbm_to_vmem [thread:$0]  %s6105_s0, 512, %s35_s22, [#allocation3], %s5741_s30, %s5741_s30, %s5742_s23  }
  0x7c   :  { %s5751_s24 = smov [#allocation7]   ;;  %s5752_s17 = smov [#allocation10]  }
  0x7d   :  { %s59_s15 = sshll.u32 %s5751_s24, 4  ;;  %s81_s18 = sshll.u32 %s5752_s17, 4  ;;  %s60_s15 = int_to_ptr.vmem [resolvable:$true] %s59_s15  ;;  %s82_s18 = int_to_ptr.vmem [resolvable:$true] %s81_s18 }
  0x7e   :  { %s5542_s19 = scalar_lea.hbm %s6107_s2, 128 }
  0x7f   :  { %p5543_p0 = scmp.ne.s32.totalorder %s6107_s2, %s5542_s19  ;;  %p5546_p1 = scmp.lt.u32.totalorder %s5542_s19, %s6107_s2 }
  0x81   :  { %p5548_p2 = pnand %p5546_p1, %p5543_p0 }
  0x83   :  { %5551 = shalt.err (!%p5548_p2)
}
  0x84   :  { %s5552_s0 = scalar_lea.vmem %s60_s15, 128  ;;  %p5557_p4 = scmp.lt.s32.totalorder %s60_s15, %s60_s15 }
  0x85   :  { %p5553_p3 = scmp.ne.s32.totalorder %s60_s15, %s5552_s0  ;;  %p5558_p5 = scmp.lt.s32.totalorder %s5552_s0, %s5552_s0 }
  0x87   :  { %p5559_p6 = por %p5558_p5, %p5557_p4 }
  0x89   :  { %p5560_p7 = pnand %p5559_p6, %p5553_p3 }
  0x8b   :  { %5563 = shalt.err (!%p5560_p7)
}
  0x8c   :  { %62 = dma.hbm_to_vmem [thread:$0]  %s6107_s2, 128, %s60_s15, [#allocation6]  }
  0x8d   :  { %s5564_s27 = scalar_lea.hbm %s6109_s4, 64 }
  0x8e   :  { %p5565_p8 = scmp.ne.s32.totalorder %s6109_s4, %s5564_s27  ;;  %p5568_p9 = scmp.lt.u32.totalorder %s5564_s27, %s6109_s4 }
  0x90   :  { %p5570_p10 = pnand %p5568_p9, %p5565_p8 }
  0x92   :  { %5573 = shalt.err (!%p5570_p10)
}
  0x93   :  { %s5574_s24 = scalar_lea.vmem %s82_s18, 64  ;;  %p5579_p12 = scmp.lt.s32.totalorder %s82_s18, %s82_s18 }
  0x94   :  { %p5575_p11 = scmp.ne.s32.totalorder %s82_s18, %s5574_s24  ;;  %p5580_p13 = scmp.lt.s32.totalorder %s5574_s24, %s5574_s24 }
  0x96   :  { %p5581_p0 = por %p5580_p13, %p5579_p12 }
  0x98   :  { %p5582_p1 = pnand %p5581_p0, %p5575_p11 }
  0x9a   :  { %5585 = shalt.err (!%p5582_p1)
}
  0x9b   :  { %84 = dma.hbm_to_vmem [thread:$0]  %s6109_s4, 64, %s82_s18, [#allocation9]  }
  0x9c   :  { %s5753_s17 = smov [#allocation13]   ;;  %s5754_s26 = smov [#allocation16]  }
  0x9d   :  { %s103_s9 = sshll.u32 %s5753_s17, 4  ;;  %s125_s19 = sshll.u32 %s5754_s26, 4  ;;  %s104_s9 = int_to_ptr.vmem [resolvable:$true] %s103_s9  ;;  %s126_s19 = int_to_ptr.vmem [resolvable:$true] %s125_s19 }
  0x9e   :  { %s5586_s21 = scalar_lea.hbm %s6111_s6, 32 }
  0x9f   :  { %p5587_p2 = scmp.ne.s32.totalorder %s6111_s6, %s5586_s21  ;;  %p5590_p3 = scmp.lt.u32.totalorder %s5586_s21, %s6111_s6 }
  0xa1   :  { %p5592_p4 = pnand %p5590_p3, %p5587_p2 }
  0xa3   :  { %5595 = shalt.err (!%p5592_p4)
}
  0xa4   :  { %s5596_s4 = scalar_lea.vmem %s104_s9, 32  ;;  %p5601_p6 = scmp.lt.s32.totalorder %s104_s9, %s104_s9 }
  0xa5   :  { %p5597_p5 = scmp.ne.s32.totalorder %s104_s9, %s5596_s4  ;;  %p5602_p7 = scmp.lt.s32.totalorder %s5596_s4, %s5596_s4 }
  0xa7   :  { %p5603_p8 = por %p5602_p7, %p5601_p6 }
  0xa9   :  { %p5604_p9 = pnand %p5603_p8, %p5597_p5 }
  0xab   :  { %5607 = shalt.err (!%p5604_p9)
}
  0xac   :  { %106 = dma.hbm_to_vmem [thread:$0]  %s6111_s6, 32, %s104_s9, [#allocation12]  }
  0xad   :  { %s5608_s29 = scalar_lea.hbm %s6113_s8, 32 }
  0xae   :  { %p5609_p10 = scmp.ne.s32.totalorder %s6113_s8, %s5608_s29  ;;  %p5612_p11 = scmp.lt.u32.totalorder %s5608_s29, %s6113_s8 }
  0xb0   :  { %p5614_p12 = pnand %p5612_p11, %p5609_p10 }
  0xb2   :  { %5617 = shalt.err (!%p5614_p12)
}
  0xb3   :  { %s5618_s2 = scalar_lea.vmem %s126_s19, 32  ;;  %p5623_p0 = scmp.lt.s32.totalorder %s126_s19, %s126_s19 }
  0xb4   :  { %p5619_p13 = scmp.ne.s32.totalorder %s126_s19, %s5618_s2  ;;  %p5624_p1 = scmp.lt.s32.totalorder %s5618_s2, %s5618_s2 }
  0xb6   :  { %p5625_p2 = por %p5624_p1, %p5623_p0 }
  0xb8   :  { %p5626_p3 = pnand %p5625_p2, %p5619_p13 }
  0xba   :  { %5629 = shalt.err (!%p5626_p3)
}
  0xbb   :  { %128 = dma.hbm_to_vmem [thread:$0]  %s6113_s8, 32, %s126_s19, [#allocation15]  }
  0xbc   :  { %s5755_s17 = smov [#allocation19]   ;;  %s5756_s26 = smov [#allocation22]  }
  0xbd   :  { %s147_s9 = sshll.u32 %s5755_s17, 4  ;;  %s169_s20 = sshll.u32 %s5756_s26, 4  ;;  %s148_s9 = int_to_ptr.vmem [resolvable:$true] %s147_s9  ;;  %s170_s20 = int_to_ptr.vmem [resolvable:$true] %s169_s20 }
  0xbe   :  { %s5630_s1 = scalar_lea.hbm %s6115_s10, 16 }
  0xbf   :  { %p5631_p4 = scmp.ne.s32.totalorder %s6115_s10, %s5630_s1  ;;  %p5634_p5 = scmp.lt.u32.totalorder %s5630_s1, %s6115_s10 }
  0xc1   :  { %p5636_p6 = pnand %p5634_p5, %p5631_p4 }
  0xc3   :  { %5639 = shalt.err (!%p5636_p6)
}
  0xc4   :  { %s5640_s8 = scalar_lea.vmem %s148_s9, 16  ;;  %s5644_s19 = scalar_lea.vmem %s148_s9, 32 }
  0xc5   :  { %p5641_p7 = scmp.ne.s32.totalorder %s148_s9, %s5640_s8  ;;  %p5645_p8 = scmp.lt.s32.totalorder %s148_s9, %s148_s9 }
  0xc6   :  { %p5646_p9 = scmp.lt.s32.totalorder %s5644_s19, %s5640_s8 }
  0xc8   :  { %p5647_p10 = por %p5646_p9, %p5645_p8 }
  0xca   :  { %p5648_p11 = pnand %p5647_p10, %p5641_p7 }
  0xcc   :  { %5651 = shalt.err (!%p5648_p11)
}
  0xcd   :  { %150 = dma.hbm_to_vmem [thread:$0]  %s6115_s10, 16, %s148_s9, [#allocation18]  }
  0xce   :  { %s5652_s29 = scalar_lea.hbm %s6117_s12, 16 }
  0xcf   :  { %p5653_p12 = scmp.ne.s32.totalorder %s6117_s12, %s5652_s29  ;;  %p5656_p13 = scmp.lt.u32.totalorder %s5652_s29, %s6117_s12 }
  0xd1   :  { %p5658_p0 = pnand %p5656_p13, %p5653_p12 }
  0xd3   :  { %5661 = shalt.err (!%p5658_p0)
}
  0xd4   :  { %s5662_s2 = scalar_lea.vmem %s170_s20, 16  ;;  %s5666_s6 = scalar_lea.vmem %s170_s20, 32 }
  0xd5   :  { %p5663_p1 = scmp.ne.s32.totalorder %s170_s20, %s5662_s2  ;;  %p5667_p2 = scmp.lt.s32.totalorder %s170_s20, %s170_s20 }
  0xd6   :  { %p5668_p3 = scmp.lt.s32.totalorder %s5666_s6, %s5662_s2 }
  0xd8   :  { %p5669_p4 = por %p5668_p3, %p5667_p2 }
  0xda   :  { %p5670_p5 = pnand %p5669_p4, %p5663_p1 }
  0xdc   :  { %5673 = shalt.err (!%p5670_p5)
}
  0xdd   :  { %172 = dma.hbm_to_vmem [thread:$0]  %s6117_s12, 16, %s170_s20, [#allocation21]  }
  0xde   :  { %5718 = dma.done.wait [#allocation3], 512  }
  0xdf   :  { %5719 = vsyncadd [#allocation3], 4294966784 }
  0xe0   :  { %5720 = dma.done.wait [#allocation6], 16512  }
  0xe1   :  { %5721 = vsyncadd [#allocation6], 4294950784 }
  0xe2   :  { %5722 = dma.done.wait [#allocation9], 32832  }
  0xe3   :  { %5723 = vsyncadd [#allocation9], 4294934464 }
  0xe4   :  { %5724 = dma.done.wait [#allocation12], 8224  }
  0xe5   :  { %5725 = vsyncadd [#allocation12], 4294959072 }
  0xe6   :  { %5726 = dma.done.wait [#allocation15], 4128  }
  0xe7   :  { %5727 = vsyncadd [#allocation15], 4294963168 }
  0xe8   :  { %5728 = dma.done.wait [#allocation18], 2064  }
  0xe9   :  { %5729 = vsyncadd [#allocation18], 4294965232 }
  0xea   :  { %5730 = dma.done.wait [#allocation21], 1040  }
  0xeb   :  { %5731 = vsyncadd [#allocation21], 4294966256  ;;  %v219_v0 = vld [vmem:[#allocation5] sm:$0xff]  ;;  %v220_v17 = vld [vmem:[#allocation5 + $0x8] sm:$0xff]  ;;  %vm5758_vm0 = vmmov 0   ;;  %s5759_s12 = smov [#allocation23]  }
  0xec   :  { %v223_v1 = vld [vmem:[#allocation5 + $0x20] sm:$0xff]  ;;  %v224_v18 = vld [vmem:[#allocation5 + $0x28] sm:$0xff]  ;;  %v216_v20 = vld [vmem:[#allocation2 + $0x18] sm:$0xff]  ;;  %s4180_s17 = sshll.u32 %s5759_s12, 4  ;;  %s4181_s17 = int_to_ptr.vmem [resolvable:$true] %s4180_s17 }
  0xed   :  { %v227_v2 = vld [vmem:[#allocation5 + $0x40] sm:$0xff]  ;;  %v4215_v3 = vcombine.high %v219_v0, %v223_v1  ;;  %v4214_v4 = vcombine.low %v219_v0, %v223_v1  ;;  %v214_v19 = vld [vmem:[#allocation2 + $0x8] sm:$0xff]  ;;  %v4217_v22 = vcombine.high %v220_v17, %v224_v18  ;;  %v4216_v23 = vcombine.low %v220_v17, %v224_v18  ;;  %s5674_s9 = scalar_lea.vmem %s4181_s17, 256  ;;  %p5679_p7 = scmp.lt.s32.totalorder %s4181_s17, %s4181_s17 }
  0xee   :  { %v231_v5 = vld [vmem:[#allocation5 + $0x60] sm:$0xff]  ;;  %v6004_v24 = vpack.c.bf16 %v216_v20, %v214_v19  ;;  %v228_v25 = vld [vmem:[#allocation5 + $0x48] sm:$0xff]  ;;  %p5675_p6 = scmp.ne.s32.totalorder %s4181_s17, %s5674_s9  ;;  %p5680_p8 = scmp.lt.s32.totalorder %s5674_s9, %s5674_s9 }
  0xef   :  { %v4223_v6 = vcombine.high %v227_v2, %v231_v5  ;;  %v235_v7 = vld [vmem:[#allocation5 + $0x80] sm:$0xff]  ;;  %1029 = vmatprep.subr.bf16.mxu0 %v4215_v3  ;;  %v4222_v9 = vcombine.low %v227_v2, %v231_v5  ;;  %v232_v27 = vld [vmem:[#allocation5 + $0x68] sm:$0xff]  ;;  %1072 = vmatprep.subr.bf16.mxu1 %v4217_v22 }
  0xf0   :  { %v239_v8 = vld [vmem:[#allocation5 + $0xa0] sm:$0xff]  ;;  %1030 = vmatpush1.bf16.msra.mxu0 %v4214_v4  ;;  %v236_v28 = vld [vmem:[#allocation5 + $0x88] sm:$0xff]  ;;  %1061 = vmatprep.mubr.bf16.mxu0 %v6004_v24  ;;  %v4225_v32 = vcombine.high %v228_v25, %v232_v27  ;;  %v4224_v33 = vcombine.low %v228_v25, %v232_v27  ;;  %p5681_p9 = por %p5680_p8, %p5679_p7 }
  0xf1   :  { %1031 = vmatprep.subr.bf16.mxu0 %v4223_v6  ;;  %v4231_v10 = vcombine.high %v235_v7, %v239_v8  ;;  %v243_v11 = vld [vmem:[#allocation5 + $0xc0] sm:$0xff]  ;;  %v4230_v13 = vcombine.low %v235_v7, %v239_v8  ;;  %v240_v29 = vld [vmem:[#allocation5 + $0xa8] sm:$0xff]  ;;  %1073 = vmatpush1.bf16.msra.mxu1 %v4216_v23 }
  0xf2   :  { %v247_v12 = vld [vmem:[#allocation5 + $0xe0] sm:$0xff]  ;;  %1104 = vmatprep.mubr.bf16.mxu1 %v6004_v24  ;;  %1074 = vmatprep.subr.bf16.mxu1 %v4225_v32  ;;  %v4233_v35 = vcombine.high %v236_v28, %v240_v29  ;;  %v244_v37 = vld [vmem:[#allocation5 + $0xc8] sm:$0xff]  ;;  %v4232_v41 = vcombine.low %v236_v28, %v240_v29  ;;  %p5682_p10 = pnand %p5681_p9, %p5675_p6 }
  0xf3   :  { %v4239_v14 = vcombine.high %v243_v11, %v247_v12  ;;  %v251_v15 = vld [vmem:[#allocation5 + $0x100] sm:$0xff]  ;;  %v4238_v21 = vcombine.low %v243_v11, %v247_v12  ;;  %v248_v38 = vld [vmem:[#allocation5 + $0xe8] sm:$0xff] }
  0xf4   :  { %1032 = vmatpush1.bf16.msra.mxu0 %v4222_v9  ;;  %v255_v16 = vld [vmem:[#allocation5 + $0x120] sm:$0xff]  ;;  %v4241_v43 = vcombine.high %v244_v37, %v248_v38  ;;  %v252_v45 = vld [vmem:[#allocation5 + $0x108] sm:$0xff]  ;;  %v4240_v49 = vcombine.low %v244_v37, %v248_v38 }
  0xf5   :  { %1033 = vmatprep.subr.bf16.mxu0 %v4231_v10  ;;  %v4247_v26 = vcombine.high %v251_v15, %v255_v16  ;;  %v259_v30 = vld [vmem:[#allocation5 + $0x140] sm:$0xff]  ;;  %v4246_v34 = vcombine.low %v251_v15, %v255_v16  ;;  %1075 = vmatpush1.bf16.msra.mxu1 %v4224_v33  ;;  %v256_v46 = vld [vmem:[#allocation5 + $0x128] sm:$0xff] }
  0xf6   :  { %v263_v31 = vld [vmem:[#allocation5 + $0x160] sm:$0xff]  ;;  %1076 = vmatprep.subr.bf16.mxu1 %v4233_v35  ;;  %v4249_v51 = vcombine.high %v252_v45, %v256_v46  ;;  %v260_v53 = vld [vmem:[#allocation5 + $0x148] sm:$0xff]  ;;  %v4248_v57 = vcombine.low %v252_v45, %v256_v46 }
  0xf7   :  { %v4255_v36 = vcombine.high %v259_v30, %v263_v31  ;;  %v267_v39 = vld [vmem:[#allocation5 + $0x180] sm:$0xff]  ;;  %v4254_v42 = vcombine.low %v259_v30, %v263_v31  ;;  %v264_v54 = vld [vmem:[#allocation5 + $0x168] sm:$0xff] }
  0xf8   :  { %1034 = vmatpush1.bf16.msra.mxu0 %v4230_v13  ;;  %v271_v40 = vld [vmem:[#allocation5 + $0x1a0] sm:$0xff]  ;;  %v4257_v59 = vcombine.high %v260_v53, %v264_v54  ;;  %v268_v61 = vld [vmem:[#allocation5 + $0x188] sm:$0xff]  ;;  %v4256_v1 = vcombine.low %v260_v53, %v264_v54 }
  0xf9   :  { %1035 = vmatprep.subr.bf16.mxu0 %v4239_v14  ;;  %v4263_v44 = vcombine.high %v267_v39, %v271_v40  ;;  %v275_v47 = vld [vmem:[#allocation5 + $0x1c0] sm:$0xff]  ;;  %1077 = vmatpush1.bf16.msra.mxu1 %v4232_v41  ;;  %v4262_v50 = vcombine.low %v267_v39, %v271_v40  ;;  %v272_v62 = vld [vmem:[#allocation5 + $0x1a8] sm:$0xff] }
  0xfa   :  { %v279_v48 = vld [vmem:[#allocation5 + $0x1e0] sm:$0xff]  ;;  %1078 = vmatprep.subr.bf16.mxu1 %v4241_v43  ;;  %v4265_v3 = vcombine.high %v268_v61, %v272_v62  ;;  %v276_v5 = vld [vmem:[#allocation5 + $0x1c8] sm:$0xff]  ;;  %v4264_v9 = vcombine.low %v268_v61, %v272_v62 }
  0xfb   :  { %v4271_v52 = vcombine.high %v275_v47, %v279_v48  ;;  %v283_v55 = vld [vmem:[#allocation5 + $0x200] sm:$0xff]  ;;  %v4270_v58 = vcombine.low %v275_v47, %v279_v48  ;;  %v280_v6 = vld [vmem:[#allocation5 + $0x1e8] sm:$0xff] }
  0xfc   :  { %1036 = vmatpush1.bf16.msra.mxu0 %v4238_v21  ;;  %v287_v56 = vld [vmem:[#allocation5 + $0x220] sm:$0xff]  ;;  %v4273_v11 = vcombine.high %v276_v5, %v280_v6  ;;  %v284_v13 = vld [vmem:[#allocation5 + $0x208] sm:$0xff]  ;;  %v4272_v17 = vcombine.low %v276_v5, %v280_v6 }
  0xfd   :  { %1037 = vmatprep.subr.bf16.mxu0 %v4247_v26  ;;  %1079 = vmatpush1.bf16.msra.mxu1 %v4240_v49  ;;  %v4279_v60 = vcombine.high %v283_v55, %v287_v56  ;;  %v291_v63 = vld [vmem:[#allocation5 + $0x240] sm:$0xff]  ;;  %v4278_v2 = vcombine.low %v283_v55, %v287_v56  ;;  %v288_v14 = vld [vmem:[#allocation5 + $0x228] sm:$0xff]  ;;  %v221_v56 = vld [vmem:[#allocation5 + $0x10] sm:$0xff] }
  0xfe   :  { %1080 = vmatprep.subr.bf16.mxu1 %v4249_v51  ;;  %v295_v0 = vld [vmem:[#allocation5 + $0x260] sm:$0xff]  ;;  %v4281_v19 = vcombine.high %v284_v13, %v288_v14  ;;  %v292_v21 = vld [vmem:[#allocation5 + $0x248] sm:$0xff]  ;;  %v4280_v26 = vcombine.low %v284_v13, %v288_v14 }
  0xff   :  { %v4287_v4 = vcombine.high %v291_v63, %v295_v0  ;;  %v299_v7 = vld [vmem:[#allocation5 + $0x280] sm:$0xff]  ;;  %v4286_v10 = vcombine.low %v291_v63, %v295_v0  ;;  %v296_v22 = vld [vmem:[#allocation5 + $0x268] sm:$0xff] }
 0x100   :  { %1038 = vmatpush1.bf16.msra.mxu0 %v4246_v34  ;;  %v303_v8 = vld [vmem:[#allocation5 + $0x2a0] sm:$0xff]  ;;  %v4289_v28 = vcombine.high %v292_v21, %v296_v22  ;;  %v300_v29 = vld [vmem:[#allocation5 + $0x288] sm:$0xff]  ;;  %v4288_v34 = vcombine.low %v292_v21, %v296_v22 }
 0x101   :  { %1039 = vmatprep.subr.bf16.mxu0 %v4255_v36  ;;  %1081 = vmatpush1.bf16.msra.mxu1 %v4248_v57  ;;  %v4295_v12 = vcombine.high %v299_v7, %v303_v8  ;;  %v307_v15 = vld [vmem:[#allocation5 + $0x2c0] sm:$0xff]  ;;  %v4294_v18 = vcombine.low %v299_v7, %v303_v8  ;;  %v304_v31 = vld [vmem:[#allocation5 + $0x2a8] sm:$0xff]  ;;  %v225_v57 = vld [vmem:[#allocation5 + $0x30] sm:$0xff] }
 0x102   :  { %1082 = vmatprep.subr.bf16.mxu1 %v4257_v59  ;;  %v311_v16 = vld [vmem:[#allocation5 + $0x2e0] sm:$0xff]  ;;  %v4297_v36 = vcombine.high %v300_v29, %v304_v31  ;;  %v308_v37 = vld [vmem:[#allocation5 + $0x2c8] sm:$0xff]  ;;  %v215_v59 = vld [vmem:[#allocation2 + $0x10] sm:$0xff]  ;;  %v4218_v8 = vcombine.low %v221_v56, %v225_v57 }
 0x103   :  { %v4303_v20 = vcombine.high %v307_v15, %v311_v16  ;;  %v315_v23 = vld [vmem:[#allocation5 + $0x300] sm:$0xff]  ;;  %v4302_v27 = vcombine.low %v307_v15, %v311_v16  ;;  %v312_v39 = vld [vmem:[#allocation5 + $0x2e8] sm:$0xff]  ;;  %v222_v16 = vld [vmem:[#allocation5 + $0x18] sm:$0xff] }
 0x104   :  { %1040 = vmatpush1.bf16.msra.mxu0 %v4254_v42  ;;  %v319_v25 = vld [vmem:[#allocation5 + $0x320] sm:$0xff]  ;;  %v4296_v42 = vcombine.low %v300_v29, %v304_v31  ;;  %v316_v45 = vld [vmem:[#allocation5 + $0x308] sm:$0xff]  ;;  %v257_v29 = vld [vmem:[#allocation5 + $0x130] sm:$0xff] }
 0x105   :  { %1041 = vmatprep.subr.bf16.mxu0 %v4263_v44  ;;  %1083 = vmatpush1.bf16.msra.mxu1 %v4256_v1  ;;  %v4311_v30 = vcombine.high %v315_v23, %v319_v25  ;;  %v323_v32 = vld [vmem:[#allocation5 + $0x340] sm:$0xff]  ;;  %v4310_v35 = vcombine.low %v315_v23, %v319_v25  ;;  %v4305_v44 = vcombine.high %v308_v37, %v312_v39  ;;  %v320_v47 = vld [vmem:[#allocation5 + $0x328] sm:$0xff]  ;;  %v230_v25 = vld [vmem:[#allocation5 + $0x58] sm:$0xff] }
 0x106   :  { %1084 = vmatprep.subr.bf16.mxu1 %v4265_v3  ;;  %v327_v33 = vld [vmem:[#allocation5 + $0x360] sm:$0xff]  ;;  %v324_v53 = vld [vmem:[#allocation5 + $0x348] sm:$0xff]  ;;  %v4219_v1 = vcombine.high %v221_v56, %v225_v57  ;;  %v233_v3 = vld [vmem:[#allocation5 + $0x70] sm:$0xff] }
 0x107   :  { %v4319_v38 = vcombine.high %v323_v32, %v327_v33  ;;  %v331_v40 = vld [vmem:[#allocation5 + $0x380] sm:$0xff]  ;;  %v4318_v43 = vcombine.low %v323_v32, %v327_v33  ;;  %v328_v55 = vld [vmem:[#allocation5 + $0x368] sm:$0xff]  ;;  %v238_v33 = vld [vmem:[#allocation5 + $0x98] sm:$0xff] }
 0x108   :  { %1042 = vmatpush1.bf16.msra.mxu0 %v4262_v50  ;;  %v335_v41 = vld [vmem:[#allocation5 + $0x3a0] sm:$0xff]  ;;  %v4304_v50 = vcombine.low %v308_v37, %v312_v39  ;;  %v4321_v62 = vcombine.high %v324_v53, %v328_v55  ;;  %v332_v63 = vld [vmem:[#allocation5 + $0x388] sm:$0xff]  ;;  %v4320_v5 = vcombine.low %v324_v53, %v328_v55  ;;  %v265_v37 = vld [vmem:[#allocation5 + $0x170] sm:$0xff] }
 0x109   :  { %1043 = vmatprep.subr.bf16.mxu0 %v4271_v52  ;;  %1085 = vmatpush1.bf16.msra.mxu1 %v4264_v9  ;;  %v4327_v46 = vcombine.high %v331_v40, %v335_v41  ;;  %v339_v48 = vld [vmem:[#allocation5 + $0x3c0] sm:$0xff]  ;;  %v4326_v51 = vcombine.low %v331_v40, %v335_v41  ;;  %v4313_v52 = vcombine.high %v316_v45, %v320_v47  ;;  %v336_v0 = vld [vmem:[#allocation5 + $0x3a8] sm:$0xff]  ;;  %v269_v40 = vld [vmem:[#allocation5 + $0x190] sm:$0xff] }
 0x10a   :  { %1086 = vmatprep.subr.bf16.mxu1 %v4273_v11  ;;  %v343_v49 = vld [vmem:[#allocation5 + $0x3e0] sm:$0xff]  ;;  %v4329_v6 = vcombine.high %v332_v63, %v336_v0  ;;  %v340_v7 = vld [vmem:[#allocation5 + $0x3c8] sm:$0xff]  ;;  %v237_v11 = vld [vmem:[#allocation5 + $0x90] sm:$0xff]  ;;  %v4328_v13 = vcombine.low %v332_v63, %v336_v0 }
 0x10b   :  { %v4335_v54 = vcombine.high %v339_v48, %v343_v49  ;;  %v4334_v61 = vcombine.low %v339_v48, %v343_v49  ;;  %v344_v9 = vld [vmem:[#allocation5 + $0x3e8] sm:$0xff]  ;;  %v273_v41 = vld [vmem:[#allocation5 + $0x1b0] sm:$0xff]  ;;  %v258_v48 = vld [vmem:[#allocation5 + $0x138] sm:$0xff] }
 0x10c   :  { %1044 = vmatpush1.bf16.msra.mxu0 %v4270_v58  ;;  %v213_v58 = vld [vmem:[#allocation2] sm:$0xff]  ;;  %v4337_v14 = vcombine.high %v340_v7, %v344_v9  ;;  %v4336_v21 = vcombine.low %v340_v7, %v344_v9  ;;  %v266_v55 = vld [vmem:[#allocation5 + $0x178] sm:$0xff]  ;;  %v4266_v56 = vcombine.low %v269_v40, %v273_v41  ;;  %v285_v57 = vld [vmem:[#allocation5 + $0x210] sm:$0xff] }
 0x10d   :  { %1045 = vmatprep.subr.bf16.mxu0 %v4279_v60  ;;  %1087 = vmatpush1.bf16.msra.mxu1 %v4272_v17  ;;  %v4312_v60 = vcombine.low %v316_v45, %v320_v47  ;;  %v250_v45 = vld [vmem:[#allocation5 + $0xf8] sm:$0xff] }
 0x10e   :  { %1088 = vmatprep.subr.bf16.mxu1 %v4281_v19  ;;  %v245_v19 = vld [vmem:[#allocation5 + $0xd0] sm:$0xff]  ;;  %v254_v47 = vld [vmem:[#allocation5 + $0x118] sm:$0xff] }
 0x10f   :  { %v274_v63 = vld [vmem:[#allocation5 + $0x1b8] sm:$0xff] }
 0x110   :  { %1046 = vmatpush1.bf16.msra.mxu0 %v4278_v2  ;;  %v229_v2 = vld [vmem:[#allocation5 + $0x50] sm:$0xff]  ;;  %v278_v7 = vld [vmem:[#allocation5 + $0x1d8] sm:$0xff] }
 0x111   :  { %1047 = vmatprep.subr.bf16.mxu0 %v4287_v4  ;;  %1089 = vmatpush1.bf16.msra.mxu1 %v4280_v26  ;;  %v6008_v4 = vpack.c.bf16 %v215_v59, %v213_v58  ;;  %v4226_v15 = vcombine.low %v229_v2, %v233_v3  ;;  %v289_v58 = vld [vmem:[#allocation5 + $0x230] sm:$0xff]  ;;  %v4253_v59 = vcombine.high %v254_v47, %v258_v48 }
 0x112   :  { %1090 = vmatprep.subr.bf16.mxu1 %v4289_v28  ;;  %v253_v28 = vld [vmem:[#allocation5 + $0x110] sm:$0xff]  ;;  %v4282_v9 = vcombine.low %v285_v57, %v289_v58 }
 0x113   :  { %v4250_v39 = vcombine.low %v253_v28, %v257_v29 }
 0x114   :  { %1048 = vmatpush1.bf16.msra.mxu0 %v4286_v10  ;;  %v4227_v10 = vcombine.high %v229_v2, %v233_v3  ;;  %v297_v2 = vld [vmem:[#allocation5 + $0x270] sm:$0xff] }
 0x115   :  { %1049 = vmatprep.subr.bf16.mxu0 %v4295_v12  ;;  %1091 = vmatpush1.bf16.msra.mxu1 %v4288_v34  ;;  %v241_v12 = vld [vmem:[#allocation5 + $0xb0] sm:$0xff]  ;;  %v4251_v34 = vcombine.high %v253_v28, %v257_v29 }
 0x116   :  { %1092 = vmatprep.subr.bf16.mxu1 %v4297_v36  ;;  %v4235_v17 = vcombine.high %v237_v11, %v241_v12  ;;  %v4234_v22 = vcombine.low %v237_v11, %v241_v12  ;;  %v261_v36 = vld [vmem:[#allocation5 + $0x150] sm:$0xff] }
 0x117   :  { %v4258_v49 = vcombine.low %v261_v36, %v265_v37  ;;  %v305_v11 = vld [vmem:[#allocation5 + $0x2b0] sm:$0xff] }
 0x118   :  { %1050 = vmatpush1.bf16.msra.mxu0 %v4294_v18  ;;  %v226_v18 = vld [vmem:[#allocation5 + $0x38] sm:$0xff]  ;;  %v321_v28 = vld [vmem:[#allocation5 + $0x330] sm:$0xff] }
 0x119   :  { %1051 = vmatprep.subr.bf16.mxu0 %v4303_v20  ;;  %1093 = vmatpush1.bf16.msra.mxu1 %v4296_v42  ;;  %v249_v20 = vld [vmem:[#allocation5 + $0xf0] sm:$0xff]  ;;  %v4221_v23 = vcombine.high %v222_v16, %v226_v18 }
 0x11a   :  { %1094 = vmatprep.subr.bf16.mxu1 %v4305_v44  ;;  %v4243_v26 = vcombine.high %v245_v19, %v249_v20  ;;  %v4242_v31 = vcombine.low %v245_v19, %v249_v20  ;;  %v246_v44 = vld [vmem:[#allocation5 + $0xd8] sm:$0xff]  ;;  %v313_v19 = vld [vmem:[#allocation5 + $0x2f0] sm:$0xff] }
 0x11b   :  { %v4244_v53 = vcombine.low %v246_v44, %v250_v45 }
 0x11c   :  { %1052 = vmatpush1.bf16.msra.mxu0 %v4302_v27  ;;  %v234_v27 = vld [vmem:[#allocation5 + $0x78] sm:$0xff] }
 0x11d   :  { %1053 = vmatprep.subr.bf16.mxu0 %v4311_v30  ;;  %1095 = vmatpush1.bf16.msra.mxu1 %v4304_v50  ;;  %v4220_v30 = vcombine.low %v222_v16, %v226_v18  ;;  %v4229_v32 = vcombine.high %v230_v25, %v234_v27  ;;  %v277_v50 = vld [vmem:[#allocation5 + $0x1d0] sm:$0xff]  ;;  %v290_v16 = vld [vmem:[#allocation5 + $0x238] sm:$0xff] }
 0x11e   :  { %1096 = vmatprep.subr.bf16.mxu1 %v4313_v52  ;;  %v4267_v52 = vcombine.high %v269_v40, %v273_v41  ;;  %v309_v18 = vld [vmem:[#allocation5 + $0x2d0] sm:$0xff]  ;;  %v310_v40 = vld [vmem:[#allocation5 + $0x2d8] sm:$0xff] }
 0x11f   :  { %v314_v41 = vld [vmem:[#allocation5 + $0x2f8] sm:$0xff] }
 0x120   :  { %1054 = vmatpush1.bf16.msra.mxu0 %v4310_v35  ;;  %v242_v35 = vld [vmem:[#allocation5 + $0xb8] sm:$0xff] }
 0x121   :  { %1055 = vmatprep.subr.bf16.mxu0 %v4319_v38  ;;  %1097 = vmatpush1.bf16.msra.mxu1 %v4312_v60  ;;  %v4228_v38 = vcombine.low %v230_v25, %v234_v27  ;;  %v4237_v42 = vcombine.high %v238_v33, %v242_v35  ;;  %v298_v25 = vld [vmem:[#allocation5 + $0x278] sm:$0xff]  ;;  %v317_v27 = vld [vmem:[#allocation5 + $0x310] sm:$0xff] }
 0x122   :  { %1098 = vmatprep.subr.bf16.mxu1 %v4321_v62  ;;  %v270_v62 = vld [vmem:[#allocation5 + $0x198] sm:$0xff] }
 0x123   :  { %v4269_v12 = vcombine.high %v270_v62, %v274_v63 }
 0x124   :  { %1056 = vmatpush1.bf16.msra.mxu0 %v4318_v43  ;;  %v4259_v43 = vcombine.high %v261_v36, %v265_v37  ;;  %v329_v36 = vld [vmem:[#allocation5 + $0x370] sm:$0xff] }
 0x125   :  { %1057 = vmatprep.subr.bf16.mxu0 %v4327_v46  ;;  %1099 = vmatpush1.bf16.msra.mxu1 %v4320_v5  ;;  %v4236_v46 = vcombine.low %v238_v33, %v242_v35  ;;  %v4283_v5 = vcombine.high %v285_v57, %v289_v58  ;;  %v306_v33 = vld [vmem:[#allocation5 + $0x2b8] sm:$0xff]  ;;  %v325_v35 = vld [vmem:[#allocation5 + $0x350] sm:$0xff] }
 0x126   :  { %1100 = vmatprep.subr.bf16.mxu1 %v4329_v6 }
 0x128   :  { %1058 = vmatpush1.bf16.msra.mxu0 %v4326_v51  ;;  %v281_v51 = vld [vmem:[#allocation5 + $0x1f0] sm:$0xff] }
 0x129   :  { %1059 = vmatprep.subr.bf16.mxu0 %v4335_v54  ;;  %1101 = vmatpush1.bf16.msra.mxu1 %v4328_v13  ;;  %v262_v54 = vld [vmem:[#allocation5 + $0x158] sm:$0xff]  ;;  %v4275_v60 = vcombine.high %v277_v50, %v281_v51  ;;  %v4274_v0 = vcombine.low %v277_v50, %v281_v51  ;;  %v4322_v50 = vcombine.low %v325_v35, %v329_v36  ;;  %v341_v51 = vld [vmem:[#allocation5 + $0x3d0] sm:$0xff] }
 0x12a   :  { %1102 = vmatprep.subr.bf16.mxu1 %v4337_v14  ;;  %v4261_v3 = vcombine.high %v262_v54, %v266_v55  ;;  %v4260_v6 = vcombine.low %v262_v54, %v266_v55  ;;  %v4268_v14 = vcombine.low %v270_v62, %v274_v63  ;;  %v4308_v54 = vcombine.low %v310_v40, %v314_v41  ;;  %v326_v55 = vld [vmem:[#allocation5 + $0x358] sm:$0xff] }
 0x12b   :  { %v338_v62 = vld [vmem:[#allocation5 + $0x3b8] sm:$0xff] }
 0x12c   :  { %1060 = vmatpush1.bf16.msra.mxu0 %v4334_v61  ;;  %v4252_v61 = vcombine.low %v254_v47, %v258_v48  ;;  %v318_v48 = vld [vmem:[#allocation5 + $0x318] sm:$0xff] }
 0x12d   :  { %1115 = vmatprep.subr.bf16.mxu0 %v4219_v1  ;;  %1103 = vmatpush1.bf16.msra.mxu1 %v4336_v21  ;;  %v293_v1 = vld [vmem:[#allocation5 + $0x250] sm:$0xff]  ;;  %v4838_v63 = vld [vmem:[#allocation8 + $0x4] ss:$16 sps:$4 sm:$0xff]  }
 0x12e   :  { %1158 = vmatprep.subr.bf16.mxu1 %v4221_v23  ;;  %v4291_v13 = vcombine.high %v293_v1, %v297_v2  ;;  %v294_v23 = vld [vmem:[#allocation5 + $0x258] sm:$0xff] }
 0x12f   :  { %1062 = vmatmul.mubr.bf16.vlgmr.msra.gmra.mrb[0].mxu0 %v6008_v4  ;;  %v4293_v37 = vcombine.high %v294_v23, %v298_v25 }
 0x130   :  { %1116 = vmatpush1.bf16.msra.mxu0 %v4218_v8  ;;  %1147 = vmatprep.mubr.bf16.mxu0 %v6004_v24  ;;  %v282_v8 = vld [vmem:[#allocation5 + $0x1f8] sm:$0xff] }
 0x131   :  { %1117 = vmatprep.subr.bf16.mxu0 %v4227_v10  ;;  %1105 = vmatmul.mubr.bf16.vlgmr.msra.gmra.mrb[0].mxu1 %v6008_v4  ;;  %v301_v10 = vld [vmem:[#allocation5 + $0x290] sm:$0xff]  ;;  %v4277_v20 = vcombine.high %v278_v7, %v282_v8 }
 0x132   :  { %1159 = vmatpush1.bf16.msra.mxu1 %v4220_v30  ;;  %1190 = vmatprep.mubr.bf16.mxu1 %v6004_v24  ;;  %v4245_v24 = vcombine.high %v246_v44, %v250_v45  ;;  %v4299_v21 = vcombine.high %v301_v10, %v305_v11  ;;  %v4307_v30 = vcombine.high %v309_v18, %v313_v19  ;;  %v337_v44 = vld [vmem:[#allocation5 + $0x3b0] sm:$0xff] }
 0x133   :  { %1160 = vmatprep.subr.bf16.mxu1 %v4229_v32  ;;  %v302_v32 = vld [vmem:[#allocation5 + $0x298] sm:$0xff] }
 0x134   :  { %1118 = vmatpush1.bf16.msra.mxu0 %v4226_v15  ;;  %v286_v15 = vld [vmem:[#allocation5 + $0x218] sm:$0xff]  ;;  %v4301_v45 = vcombine.high %v302_v32, %v306_v33  ;;  %v4300_v47 = vcombine.low %v302_v32, %v306_v33  ;;  %v4863_v33 = vld [vmem:[#allocation8 + $0x88] ss:$16 sps:$4 sm:$0xff]  }
 0x135   :  { %1119 = vmatprep.subr.bf16.mxu0 %v4235_v17  ;;  %v4290_v17 = vcombine.low %v293_v1, %v297_v2  ;;  %v4285_v29 = vcombine.high %v286_v15, %v290_v16  ;;  %v4836_v2 = vld [vmem:[#allocation8] ss:$16 sps:$4 sm:$0xff]  }
 0x136   :  { %1161 = vmatpush1.bf16.msra.mxu1 %v4228_v38  ;;  %v4315_v38 = vcombine.high %v317_v27, %v321_v28  ;;  %v4872_v32 = vld [vmem:[#allocation8 + $0xc0] ss:$16 sps:$4 sm:$0xff]  }
 0x137   :  { %1162 = vmatprep.subr.bf16.mxu1 %v4237_v42  ;;  %v4314_v42 = vcombine.low %v317_v27, %v321_v28  ;;  %v4859_v27 = vld [vmem:[#allocation8 + $0x6c] ss:$16 sps:$4 sm:$0xff]   ;;  %v4866_v28 = vld [vmem:[#allocation8 + $0xa0] ss:$16 sps:$4 sm:$0xff]  }
 0x138   :  { %1120 = vmatpush1.bf16.msra.mxu0 %v4234_v22  ;;  %v4276_v22 = vcombine.low %v278_v7, %v282_v8  ;;  %v4844_v7 = vld [vmem:[#allocation8 + $0x24] ss:$16 sps:$4 sm:$0xff]  }
 0x139   :  { %1121 = vmatprep.subr.bf16.mxu0 %v4243_v26  ;;  %v4298_v26 = vcombine.low %v301_v10, %v305_v11  ;;  %v4850_v11 = vld [vmem:[#allocation8 + $0x44] ss:$16 sps:$4 sm:$0xff]  }
 0x13a   :  { %1163 = vmatpush1.bf16.msra.mxu1 %v4236_v46  ;;  %v4323_v46 = vcombine.high %v325_v35, %v329_v36  ;;  %v4878_v35 = vld [vmem:[#allocation8 + $0xe0] ss:$16 sps:$4 sm:$0xff]   ;;  %v4886_v36 = vld [vmem:[#allocation8 + $0x104] ss:$16 sps:$4 sm:$0xff]  }
 0x13b   :  { %1164 = vmatprep.subr.bf16.mxu1 %v4245_v24  ;;  %v345_v24 = vld [vmem:[#allocation5 + $0x3f0] sm:$0xff] }
 0x13c   :  { %1122 = vmatpush1.bf16.msra.mxu0 %v4242_v31  ;;  %v4284_v31 = vcombine.low %v286_v15, %v290_v16  ;;  %v4856_v16 = vld [vmem:[#allocation8 + $0x64] ss:$16 sps:$4 sm:$0xff]  }
 0x13d   :  { %1123 = vmatprep.subr.bf16.mxu0 %v4251_v34  ;;  %v4306_v34 = vcombine.low %v309_v18, %v313_v19  ;;  %v4847_v18 = vld [vmem:[#allocation8 + $0x2c] ss:$16 sps:$4 sm:$0xff]   ;;  %v4854_v19 = vld [vmem:[#allocation8 + $0x60] ss:$16 sps:$4 sm:$0xff]  }
 0x13e   :  { %1165 = vmatpush1.bf16.msra.mxu1 %v4244_v53 }
 0x13f   :  { %1166 = vmatprep.subr.bf16.mxu1 %v4253_v59  ;;  %v4339_v59 = vcombine.high %v341_v51, %v345_v24 }
 0x140   :  { %1124 = vmatpush1.bf16.msra.mxu0 %v4250_v39  ;;  %v4292_v39 = vcombine.low %v294_v23, %v298_v25  ;;  %v4860_v23 = vld [vmem:[#allocation8 + $0x80] ss:$16 sps:$4 sm:$0xff]   ;;  %v4868_v25 = vld [vmem:[#allocation8 + $0xa4] ss:$16 sps:$4 sm:$0xff]  }
 0x141   :  { %1125 = vmatprep.subr.bf16.mxu0 %v4259_v43  ;;  %v333_v43 = vld [vmem:[#allocation5 + $0x390] sm:$0xff] }
 0x142   :  { %1167 = vmatpush1.bf16.msra.mxu1 %v4252_v61  ;;  %v4331_v53 = vcombine.high %v333_v43, %v337_v44  ;;  %v4330_v57 = vcombine.low %v333_v43, %v337_v44  ;;  %v334_v61 = vld [vmem:[#allocation5 + $0x398] sm:$0xff] }
 0x143   :  { %1168 = vmatprep.subr.bf16.mxu1 %v4261_v3  ;;  %v4333_v8 = vcombine.high %v334_v61, %v338_v62  ;;  %v4332_v10 = vcombine.low %v334_v61, %v338_v62  ;;  %v4890_v43 = vld [vmem:[#allocation8 + $0x120] ss:$16 sps:$4 sm:$0xff]   ;;  %v4898_v44 = vld [vmem:[#allocation8 + $0x144] ss:$16 sps:$4 sm:$0xff]   ;;  %v4913_v61 = vld [vmem:[#allocation8 + $0x18c] ss:$16 sps:$4 sm:$0xff]  }
 0x144   :  { %1126 = vmatpush1.bf16.msra.mxu0 %v4258_v49  ;;  %v322_v49 = vld [vmem:[#allocation5 + $0x338] sm:$0xff] }
 0x145   :  { %1127 = vmatprep.subr.bf16.mxu0 %v4267_v52  ;;  %v4309_v52 = vcombine.high %v310_v40, %v314_v41  ;;  %v4317_v58 = vcombine.high %v318_v48, %v322_v49  ;;  %v4892_v40 = vld [vmem:[#allocation8 + $0x124] ss:$16 sps:$4 sm:$0xff]   ;;  %v4875_v41 = vld [vmem:[#allocation8 + $0xc8] ss:$16 sps:$4 sm:$0xff]   ;;  %v4920_v62 = vld [vmem:[#allocation8 + $0x1c0] ss:$16 sps:$4 sm:$0xff]  }
 0x146   :  { %1169 = vmatpush1.bf16.msra.mxu1 %v4260_v6  ;;  %v346_v6 = vld [vmem:[#allocation5 + $0x3f8] sm:$0xff] }
 0x147   :  { %1170 = vmatprep.subr.bf16.mxu1 %v4269_v12 }
 0x148   :  { %1128 = vmatpush1.bf16.msra.mxu0 %v4266_v56  ;;  %v330_v56 = vld [vmem:[#allocation5 + $0x378] sm:$0xff] }
 0x149   :  { %1129 = vmatprep.subr.bf16.mxu0 %v4275_v60  ;;  %v4316_v60 = vcombine.low %v318_v48, %v322_v49  ;;  %v4325_v1 = vcombine.high %v326_v55, %v330_v56  ;;  %v4324_v3 = vcombine.low %v326_v55, %v330_v56  ;;  %v4904_v48 = vld [vmem:[#allocation8 + $0x164] ss:$16 sps:$4 sm:$0xff]   ;;  %v4887_v49 = vld [vmem:[#allocation8 + $0x108] ss:$16 sps:$4 sm:$0xff]  }
 0x14a   :  { %1171 = vmatpush1.bf16.msra.mxu1 %v4268_v14  ;;  %v4848_v14 = vld [vmem:[#allocation8 + $0x40] ss:$16 sps:$4 sm:$0xff]   ;;  %v4916_v55 = vld [vmem:[#allocation8 + $0x1a4] ss:$16 sps:$4 sm:$0xff]   ;;  %v4899_v56 = vld [vmem:[#allocation8 + $0x148] ss:$16 sps:$4 sm:$0xff]  }
 0x14b   :  { %1172 = vmatprep.subr.bf16.mxu1 %v4277_v20  ;;  %v4862_v20 = vld [vmem:[#allocation8 + $0x84] ss:$16 sps:$4 sm:$0xff]  }
 0x14c   :  { %1130 = vmatpush1.bf16.msra.mxu0 %v4274_v0  ;;  %v4338_v0 = vcombine.low %v341_v51, %v345_v24  ;;  %v4902_v51 = vld [vmem:[#allocation8 + $0x160] ss:$16 sps:$4 sm:$0xff]   ;;  %v4910_v24 = vld [vmem:[#allocation8 + $0x184] ss:$16 sps:$4 sm:$0xff]  }
 0x14d   :  { %1131 = vmatprep.subr.bf16.mxu0 %v4283_v5  ;;  %v342_v5 = vld [vmem:[#allocation5 + $0x3d8] sm:$0xff] }
 0x14e   :  { %1173 = vmatpush1.bf16.msra.mxu1 %v4276_v22  ;;  %v4341_v12 = vcombine.high %v342_v5, %v346_v6  ;;  %v4340_v15 = vcombine.low %v342_v5, %v346_v6  ;;  %v4853_v22 = vld [vmem:[#allocation8 + $0x4c] ss:$16 sps:$4 sm:$0xff]   ;;  %v4917_v5 = vld [vmem:[#allocation8 + $0x1a8] ss:$16 sps:$4 sm:$0xff]  }
 0x14f   :  { %1174 = vmatprep.subr.bf16.mxu1 %v4285_v29  ;;  %v4874_v29 = vld [vmem:[#allocation8 + $0xc4] ss:$16 sps:$4 sm:$0xff]   ;;  %v4925_v6 = vld [vmem:[#allocation8 + $0x1cc] ss:$16 sps:$4 sm:$0xff]  }
 0x150   :  { %1132 = vmatpush1.bf16.msra.mxu0 %v4282_v9  ;;  %v4842_v9 = vld [vmem:[#allocation8 + $0x20] ss:$16 sps:$4 sm:$0xff]  }
 0x151   :  { %1133 = vmatprep.subr.bf16.mxu0 %v4291_v13  ;;  %v4841_v13 = vld [vmem:[#allocation8 + $0xc] ss:$16 sps:$4 sm:$0xff]  }
 0x152   :  { %1175 = vmatpush1.bf16.msra.mxu1 %v4284_v31  ;;  %v4865_v31 = vld [vmem:[#allocation8 + $0x8c] ss:$16 sps:$4 sm:$0xff]  }
 0x153   :  { %1176 = vmatprep.subr.bf16.mxu1 %v4293_v37  ;;  %v4869_v37 = vld [vmem:[#allocation8 + $0xa8] ss:$16 sps:$4 sm:$0xff]  }
 0x154   :  { %1134 = vmatpush1.bf16.msra.mxu0 %v4290_v17  ;;  %v4839_v17 = vld [vmem:[#allocation8 + $0x8] ss:$16 sps:$4 sm:$0xff]  }
 0x155   :  { %1135 = vmatprep.subr.bf16.mxu0 %v4299_v21  ;;  %v4845_v21 = vld [vmem:[#allocation8 + $0x28] ss:$16 sps:$4 sm:$0xff]  }
 0x156   :  { %1177 = vmatpush1.bf16.msra.mxu1 %v4292_v39  ;;  %v4884_v39 = vld [vmem:[#allocation8 + $0x100] ss:$16 sps:$4 sm:$0xff]  }
 0x157   :  { %1178 = vmatprep.subr.bf16.mxu1 %v4301_v45  ;;  %v4881_v45 = vld [vmem:[#allocation8 + $0xe8] ss:$16 sps:$4 sm:$0xff]  }
 0x158   :  { %1136 = vmatpush1.bf16.msra.mxu0 %v4298_v26  ;;  %v4851_v26 = vld [vmem:[#allocation8 + $0x48] ss:$16 sps:$4 sm:$0xff]  }
 0x159   :  { %1137 = vmatprep.subr.bf16.mxu0 %v4307_v30  ;;  %v4857_v30 = vld [vmem:[#allocation8 + $0x68] ss:$16 sps:$4 sm:$0xff]  }
 0x15a   :  { %1179 = vmatpush1.bf16.msra.mxu1 %v4300_v47  ;;  %v4896_v47 = vld [vmem:[#allocation8 + $0x140] ss:$16 sps:$4 sm:$0xff]  }
 0x15b   :  { %1180 = vmatprep.subr.bf16.mxu1 %v4309_v52  ;;  %v4893_v52 = vld [vmem:[#allocation8 + $0x128] ss:$16 sps:$4 sm:$0xff]  }
 0x15c   :  { %1138 = vmatpush1.bf16.msra.mxu0 %v4306_v34  ;;  %v4871_v34 = vld [vmem:[#allocation8 + $0xac] ss:$16 sps:$4 sm:$0xff]  }
 0x15d   :  { %1139 = vmatprep.subr.bf16.mxu0 %v4315_v38  ;;  %v4877_v38 = vld [vmem:[#allocation8 + $0xcc] ss:$16 sps:$4 sm:$0xff]  }
 0x15e   :  { %1181 = vmatpush1.bf16.msra.mxu1 %v4308_v54  ;;  %v4908_v54 = vld [vmem:[#allocation8 + $0x180] ss:$16 sps:$4 sm:$0xff]  }
 0x15f   :  { %1182 = vmatprep.subr.bf16.mxu1 %v4317_v58  ;;  %v4914_v58 = vld [vmem:[#allocation8 + $0x1a0] ss:$16 sps:$4 sm:$0xff]  }
 0x160   :  { %1140 = vmatpush1.bf16.msra.mxu0 %v4314_v42  ;;  %v4883_v42 = vld [vmem:[#allocation8 + $0xec] ss:$16 sps:$4 sm:$0xff]  }
 0x161   :  { %1141 = vmatprep.subr.bf16.mxu0 %v4323_v46  ;;  %v4889_v46 = vld [vmem:[#allocation8 + $0x10c] ss:$16 sps:$4 sm:$0xff]  }
 0x162   :  { %1183 = vmatpush1.bf16.msra.mxu1 %v4316_v60  ;;  %v4905_v60 = vld [vmem:[#allocation8 + $0x168] ss:$16 sps:$4 sm:$0xff]  }
 0x163   :  { %1184 = vmatprep.subr.bf16.mxu1 %v4325_v1  ;;  %v4919_v1 = vld [vmem:[#allocation8 + $0x1ac] ss:$16 sps:$4 sm:$0xff]  }
 0x164   :  { %1142 = vmatpush1.bf16.msra.mxu0 %v4322_v50  ;;  %v4895_v50 = vld [vmem:[#allocation8 + $0x12c] ss:$16 sps:$4 sm:$0xff]  }
 0x165   :  { %1143 = vmatprep.subr.bf16.mxu0 %v4331_v53  ;;  %v4901_v53 = vld [vmem:[#allocation8 + $0x14c] ss:$16 sps:$4 sm:$0xff]  }
 0x166   :  { %1185 = vmatpush1.bf16.msra.mxu1 %v4324_v3  ;;  %v4934_v3 = vld [vmem:[#allocation8 + $0x204] ss:$16 sps:$4 sm:$0xff]  }
 0x167   :  { %1186 = vmatprep.subr.bf16.mxu1 %v4333_v8  ;;  %v4931_v8 = vld [vmem:[#allocation8 + $0x1ec] ss:$16 sps:$4 sm:$0xff]  }
 0x168   :  { %1144 = vmatpush1.bf16.msra.mxu0 %v4330_v57  ;;  %v4907_v57 = vld [vmem:[#allocation8 + $0x16c] ss:$16 sps:$4 sm:$0xff]  }
 0x169   :  { %1145 = vmatprep.subr.bf16.mxu0 %v4339_v59  ;;  %v4922_v59 = vld [vmem:[#allocation8 + $0x1c4] ss:$16 sps:$4 sm:$0xff]  }
 0x16a   :  { %1187 = vmatpush1.bf16.msra.mxu1 %v4332_v10  ;;  %v4937_v10 = vld [vmem:[#allocation8 + $0x20c] ss:$16 sps:$4 sm:$0xff]  }
 0x16b   :  { %1188 = vmatprep.subr.bf16.mxu1 %v4341_v12 }
 0x16c   :  { %1146 = vmatpush1.bf16.msra.mxu0 %v4338_v0  ;;  %v4911_v0 = vld [vmem:[#allocation8 + $0x188] ss:$16 sps:$4 sm:$0xff]  }
 0x16d   :  { %2783 = vmatprep.subr.bf16.mxu0 %v4838_v63  ;;  %v4928_v63 = vld [vmem:[#allocation8 + $0x1e4] ss:$16 sps:$4 sm:$0xff]  }
 0x16e   :  { %1189 = vmatpush1.bf16.msra.mxu1 %v4340_v15 }
 0x16f   :  { %1148 = vmatmul.mubr.bf16.vlgmr.msra.gmra.mrb[4].mxu0 %v6008_v4  ;;  %2955 = vmatprep.subr.bf16.mxu1 %v4841_v13 }
 0x170   :  { %2784 = vmatpush1.bf16.msra.mxu0 %v4836_v2  ;;  %v4926_v2 = vld [vmem:[#allocation8 + $0x1e0] ss:$16 sps:$4 sm:$0xff]  }
 0x171   :  { %2785 = vmatprep.subr.bf16.mxu0 %v4844_v7  ;;  %1191 = vmatmul.mubr.bf16.vlgmr.msra.gmra.mrb[4].mxu1 %v6008_v4  ;;  %v4880_v4 = vld [vmem:[#allocation8 + $0xe4] ss:$16 sps:$4 sm:$0xff]   ;;  %v4923_v7 = vld [vmem:[#allocation8 + $0x1c8] ss:$16 sps:$4 sm:$0xff]  }
 0x172   :  { %2956 = vmatpush1.bf16.msra.mxu1 %v4839_v17 }
 0x173   :  { %2957 = vmatprep.subr.bf16.mxu1 %v4847_v18 }
 0x174   :  { %2786 = vmatpush1.bf16.msra.mxu0 %v4842_v9  ;;  %v4929_v9 = vld [vmem:[#allocation8 + $0x1e8] ss:$16 sps:$4 sm:$0xff]  }
 0x175   :  { %2787 = vmatprep.subr.bf16.mxu0 %v4850_v11  ;;  %v349_v11 = vlaneseq }
 0x176   :  { %2958 = vmatpush1.bf16.msra.mxu1 %v4845_v21 }
 0x177   :  { %2959 = vmatprep.subr.bf16.mxu1 %v4853_v22  ;;  %v6016_v12 = vshrl.u32 %v349_v11, 7  ;;  %v4971_v11 = vld [vmem:[#allocation8 + $0x2c8] ss:$16 sps:$4 sm:$0xff]  }
 0x178   :  { %2788 = vmatpush1.bf16.msra.mxu0 %v4848_v14  ;;  %v6021_v14 = vld [vmem:[#allocation7] sm:$0xff] }
 0x179   :  { %2789 = vmatprep.subr.bf16.mxu0 %v4856_v16  ;;  %v6019_v13 = vsub.s32 0, %v6016_v12  ;;  %v6024_v15 = vsub.s32 1, %v6016_v12 }
 0x17a   :  { %2960 = vmatpush1.bf16.msra.mxu1 %v4851_v26 }
 0x17b   :  { %2961 = vmatprep.subr.bf16.mxu1 %v4859_v27  ;;  %v352_v16 = vrot.slane %v6021_v14, %v6019_v13  ;;  %v356_v17 = vrot.slane %v6021_v14, %v6024_v15  ;;  %v359_v27 = vsub.s32 2, %v6016_v12 }
 0x17c   :  { %2790 = vmatpush1.bf16.msra.mxu0 %v4854_v19 }
 0x17d   :  { %2791 = vmatprep.subr.bf16.mxu0 %v4862_v20 }
 0x17e   :  { %2962 = vmatpush1.bf16.msra.mxu1 %v4857_v30  ;;  %v363_v30 = vsub.s32 3, %v6016_v12 }
 0x17f   :  { %2963 = vmatprep.subr.bf16.mxu1 %v4865_v31 }
 0x180   :  { %2792 = vmatpush1.bf16.msra.mxu0 %v4860_v23 }
 0x181   :  { %2793 = vmatprep.subr.bf16.mxu0 %v4868_v25 }
 0x182   :  { %2964 = vmatpush1.bf16.msra.mxu1 %v4863_v33 }
 0x183   :  { %2965 = vmatprep.subr.bf16.mxu1 %v4871_v34  ;;  %v4932_v34 = vld [vmem:[#allocation8 + $0x200] ss:$16 sps:$4 sm:$0xff]  }
 0x184   :  { %2794 = vmatpush1.bf16.msra.mxu0 %v4866_v28 }
 0x185   :  { %2795 = vmatprep.subr.bf16.mxu0 %v4874_v29 }
 0x186   :  { %2966 = vmatpush1.bf16.msra.mxu1 %v4869_v37  ;;  %v4940_v37 = vld [vmem:[#allocation8 + $0x224] ss:$16 sps:$4 sm:$0xff]  }
 0x187   :  { %2967 = vmatprep.subr.bf16.mxu1 %v4877_v38  ;;  %v4943_v38 = vld [vmem:[#allocation8 + $0x22c] ss:$16 sps:$4 sm:$0xff]  }
 0x188   :  { %2796 = vmatpush1.bf16.msra.mxu0 %v4872_v32 }
 0x189   :  { %2797 = vmatprep.subr.bf16.mxu0 %v4880_v4 }
 0x18a   :  { %2968 = vmatpush1.bf16.msra.mxu1 %v4875_v41  ;;  %v4938_v41 = vld [vmem:[#allocation8 + $0x220] ss:$16 sps:$4 sm:$0xff]  }
 0x18b   :  { %2969 = vmatprep.subr.bf16.mxu1 %v4883_v42  ;;  %v4941_v42 = vld [vmem:[#allocation8 + $0x228] ss:$16 sps:$4 sm:$0xff]  }
 0x18c   :  { %2798 = vmatpush1.bf16.msra.mxu0 %v4878_v35  ;;  %v4935_v35 = vld [vmem:[#allocation8 + $0x208] ss:$16 sps:$4 sm:$0xff]  }
 0x18d   :  { %2799 = vmatprep.subr.bf16.mxu0 %v4886_v36  ;;  %v360_v36 = vrot.slane %v6021_v14, %v359_v27 }
 0x18e   :  { %2970 = vmatpush1.bf16.msra.mxu1 %v4881_v45  ;;  %v4946_v45 = vld [vmem:[#allocation8 + $0x244] ss:$16 sps:$4 sm:$0xff]  }
 0x18f   :  { %2971 = vmatprep.subr.bf16.mxu1 %v4889_v46  ;;  %v4949_v46 = vld [vmem:[#allocation8 + $0x24c] ss:$16 sps:$4 sm:$0xff]  }
 0x190   :  { %2800 = vmatpush1.bf16.msra.mxu0 %v4884_v39  ;;  %v364_v39 = vrot.slane %v6021_v14, %v363_v30 }
 0x191   :  { %2801 = vmatprep.subr.bf16.mxu0 %v4892_v40 }
 0x192   :  { %2972 = vmatpush1.bf16.msra.mxu1 %v4887_v49 }
 0x193   :  { %2973 = vmatprep.subr.bf16.mxu1 %v4895_v50 }
 0x194   :  { %2802 = vmatpush1.bf16.msra.mxu0 %v4890_v43 }
 0x195   :  { %2803 = vmatprep.subr.bf16.mxu0 %v4898_v44 }
 0x196   :  { %2974 = vmatpush1.bf16.msra.mxu1 %v4893_v52 }
 0x197   :  { %2975 = vmatprep.subr.bf16.mxu1 %v4901_v53  ;;  %v4944_v53 = vld [vmem:[#allocation8 + $0x240] ss:$16 sps:$4 sm:$0xff]  }
 0x198   :  { %2804 = vmatpush1.bf16.msra.mxu0 %v4896_v47 }
 0x199   :  { %2805 = vmatprep.subr.bf16.mxu0 %v4904_v48 }
 0x19a   :  { %2976 = vmatpush1.bf16.msra.mxu1 %v4899_v56  ;;  %v4952_v56 = vld [vmem:[#allocation8 + $0x264] ss:$16 sps:$4 sm:$0xff]  }
 0x19b   :  { %2977 = vmatprep.subr.bf16.mxu1 %v4907_v57  ;;  %v4955_v57 = vld [vmem:[#allocation8 + $0x26c] ss:$16 sps:$4 sm:$0xff]  }
 0x19c   :  { %2806 = vmatpush1.bf16.msra.mxu0 %v4902_v51 }
 0x19d   :  { %2807 = vmatprep.subr.bf16.mxu0 %v4910_v24 }
 0x19e   :  { %2978 = vmatpush1.bf16.msra.mxu1 %v4905_v60 }
 0x19f   :  { %2979 = vmatprep.subr.bf16.mxu1 %v4913_v61  ;;  %v4950_v61 = vld [vmem:[#allocation8 + $0x260] ss:$16 sps:$4 sm:$0xff]  }
 0x1a0   :  { %2808 = vmatpush1.bf16.msra.mxu0 %v4908_v54  ;;  %v4947_v54 = vld [vmem:[#allocation8 + $0x248] ss:$16 sps:$4 sm:$0xff]  }
 0x1a1   :  { %2809 = vmatprep.subr.bf16.mxu0 %v4916_v55 }
 0x1a2   :  { %2980 = vmatpush1.bf16.msra.mxu1 %v4911_v0  ;;  %v4961_v0 = vld [vmem:[#allocation8 + $0x28c] ss:$16 sps:$4 sm:$0xff]  }
 0x1a3   :  { %2981 = vmatprep.subr.bf16.mxu1 %v4919_v1  ;;  %v4956_v1 = vld [vmem:[#allocation8 + $0x280] ss:$16 sps:$4 sm:$0xff]  }
 0x1a4   :  { %2810 = vmatpush1.bf16.msra.mxu0 %v4914_v58 }
 0x1a5   :  { %2811 = vmatprep.subr.bf16.mxu0 %v4922_v59 }
 0x1a6   :  { %2982 = vmatpush1.bf16.msra.mxu1 %v4917_v5  ;;  %v4967_v5 = vld [vmem:[#allocation8 + $0x2ac] ss:$16 sps:$4 sm:$0xff]  }
 0x1a7   :  { %2983 = vmatprep.subr.bf16.mxu1 %v4925_v6  ;;  %v4962_v6 = vld [vmem:[#allocation8 + $0x2a0] ss:$16 sps:$4 sm:$0xff]  }
 0x1a8   :  { %2812 = vmatpush1.bf16.msra.mxu0 %v4920_v62  ;;  %v4953_v62 = vld [vmem:[#allocation8 + $0x268] ss:$16 sps:$4 sm:$0xff]  }
 0x1a9   :  { %2813 = vmatprep.subr.bf16.mxu0 %v4928_v63  ;;  %v4958_v63 = vld [vmem:[#allocation8 + $0x284] ss:$16 sps:$4 sm:$0xff]  }
 0x1aa   :  { %2984 = vmatpush1.bf16.msra.mxu1 %v4923_v7  ;;  %v4965_v7 = vld [vmem:[#allocation8 + $0x2a8] ss:$16 sps:$4 sm:$0xff]  }
 0x1ab   :  { %2985 = vmatprep.subr.bf16.mxu1 %v4931_v8  ;;  %v4970_v8 = vld [vmem:[#allocation8 + $0x2c4] ss:$16 sps:$4 sm:$0xff]  }
 0x1ac   :  { %2814 = vmatpush1.bf16.msra.mxu0 %v4926_v2  ;;  %v4959_v2 = vld [vmem:[#allocation8 + $0x288] ss:$16 sps:$4 sm:$0xff]  }
 0x1ad   :  { %2826 = vmatprep.subr.bf16.mxu0 %v4934_v3  ;;  %v4964_v3 = vld [vmem:[#allocation8 + $0x2a4] ss:$16 sps:$4 sm:$0xff]  }
 0x1ae   :  { %2986 = vmatpush1.bf16.msra.mxu1 %v4929_v9  ;;  %v4973_v9 = vld [vmem:[#allocation8 + $0x2cc] ss:$16 sps:$4 sm:$0xff]  }
 0x1af   :  { %2998 = vmatprep.subr.bf16.mxu1 %v4937_v10  ;;  %v4968_v10 = vld [vmem:[#allocation8 + $0x2c0] ss:$16 sps:$4 sm:$0xff]  }
 0x202   :  { %v1063_v18 = vpop.f32.mrb[0].mxu0 }
 0x203   :  { %v1064_v19 = vadd.f32 %v1063_v18, %v352_v16  ;;  %v1065_v20 = vpop.f32.mrb[1].mxu0  ;;  %v4974_v18 = vld [vmem:[#allocation8 + $0x2e0] ss:$16 sps:$4 sm:$0xff]  }
 0x204   :  { %v1066_v21 = vadd.f32 %v1065_v20, %v356_v17  ;;  %v1067_v22 = vpop.f32.mrb[2].mxu0  ;;  %v1106_v40 = vpop.f32.mrb[0].mxu1  ;;  %v4982_v20 = vld [vmem:[#allocation8 + $0x304] ss:$16 sps:$4 sm:$0xff]  }
 0x205   :  { %v1068_v23 = vadd.f32 %v1067_v22, %v352_v16  ;;  %v1069_v25 = vpop.f32.mrb[3].mxu0  ;;  %v1201_v28 = vmax.f32 %v1064_v19, 0.0  ;;  %v1107_v43 = vadd.f32 %v1106_v40, %v360_v36  ;;  %v1108_v44 = vpop.f32.mrb[1].mxu1  ;;  %v4976_v16 = vld [vmem:[#allocation8 + $0x2e4] ss:$16 sps:$4 sm:$0xff]  }
 0x206   :  { %v1070_v26 = vadd.f32 %v1069_v25, %v356_v17  ;;  %v1202_v31 = vmax.f32 %v1066_v21, 0.0  ;;  %v1109_v47 = vadd.f32 %v1108_v44, %v364_v39  ;;  %v1110_v48 = vpop.f32.mrb[2].mxu1  ;;  %v4979_v17 = vld [vmem:[#allocation8 + $0x2ec] ss:$16 sps:$4 sm:$0xff]   ;;  %v4977_v19 = vld [vmem:[#allocation8 + $0x2e8] ss:$16 sps:$4 sm:$0xff]  }
 0x207   :  { %v1209_v29 = vmax.f32 %v1068_v23, 0.0  ;;  %v1203_v49 = vmax.f32 %v1107_v43, 0.0  ;;  %v1111_v50 = vadd.f32 %v1110_v48, %v360_v36  ;;  %v1112_v51 = vpop.f32.mrb[3].mxu1  ;;  %v4985_v21 = vld [vmem:[#allocation8 + $0x30c] ss:$16 sps:$4 sm:$0xff]   ;;  %v367_v44 = vsub.s32 4, %v6016_v12 }
 0x208   :  { %v1210_v32 = vmax.f32 %v1070_v26, 0.0  ;;  %v1204_v24 = vmax.f32 %v1109_v47, 0.0  ;;  %v1113_v52 = vadd.f32 %v1112_v51, %v364_v39  ;;  %v4980_v22 = vld [vmem:[#allocation8 + $0x300] ss:$16 sps:$4 sm:$0xff]   ;;  %v4983_v23 = vld [vmem:[#allocation8 + $0x308] ss:$16 sps:$4 sm:$0xff]  }
 0x209   :  { %v1217_v4 = vpack.c.bf16 %v1209_v29, %v1201_v28  ;;  %v1211_v55 = vmax.f32 %v1111_v50, 0.0  ;;  %v4988_v25 = vld [vmem:[#allocation8 + $0x324] ss:$16 sps:$4 sm:$0xff]   ;;  %v4991_v26 = vld [vmem:[#allocation8 + $0x32c] ss:$16 sps:$4 sm:$0xff]   ;;  %v368_v50 = vrot.slane %v6021_v14, %v367_v44 }
 0x20a   :  { %v1218_v33 = vpack.c.bf16 %v1210_v32, %v1202_v31  ;;  %v1212_v58 = vmax.f32 %v1113_v52, 0.0  ;;  %v4986_v28 = vld [vmem:[#allocation8 + $0x320] ss:$16 sps:$4 sm:$0xff]   ;;  %v4989_v29 = vld [vmem:[#allocation8 + $0x328] ss:$16 sps:$4 sm:$0xff]  }
 0x20b   :  { %v6038_v59 = vpack.c.bf16 %v1211_v55, %v1203_v49  ;;  %v4994_v31 = vld [vmem:[#allocation8 + $0x344] ss:$16 sps:$4 sm:$0xff]   ;;  %v4997_v32 = vld [vmem:[#allocation8 + $0x34c] ss:$16 sps:$4 sm:$0xff]   ;;  %v4998_v36 = vld [vmem:[#allocation8 + $0x360] ss:$16 sps:$4 sm:$0xff]  }
 0x20c   :  { %2815 = vmatprep.mubr.bf16.mxu0 %v1218_v33  ;;  %2987 = vmatprep.mubr.bf16.mxu1 %v1218_v33  ;;  %v1220_v60 = vpack.c.bf16 %v1212_v58, %v1204_v24  ;;  %v4995_v33 = vld [vmem:[#allocation8 + $0x348] ss:$16 sps:$4 sm:$0xff]   ;;  %v5009_v39 = vld [vmem:[#allocation8 + $0x38c] ss:$16 sps:$4 sm:$0xff]   ;;  %v5004_v40 = vld [vmem:[#allocation8 + $0x380] ss:$16 sps:$4 sm:$0xff]  }
 0x20d   :  { %2816 = vmatmul.mubr.bf16.vlgmr.msra.gmra.mrb[8].mxu0 %v1217_v4  ;;  %2988 = vmatmul.mubr.bf16.vlgmr.msra.gmra.mrb[8].mxu1 %v1217_v4  ;;  %v4992_v4 = vld [vmem:[#allocation8 + $0x340] ss:$16 sps:$4 sm:$0xff]   ;;  %v5015_v43 = vld [vmem:[#allocation8 + $0x3ac] ss:$16 sps:$4 sm:$0xff]   ;;  %v5013_v47 = vld [vmem:[#allocation8 + $0x3a8] ss:$16 sps:$4 sm:$0xff]  }
 0x20e   :  { %2827 = vmatpush1.bf16.msra.mxu0 %v4932_v34  ;;  %2999 = vmatpush1.bf16.msra.mxu1 %v4935_v35  ;;  %v5000_v34 = vld [vmem:[#allocation8 + $0x364] ss:$16 sps:$4 sm:$0xff]   ;;  %v5003_v35 = vld [vmem:[#allocation8 + $0x36c] ss:$16 sps:$4 sm:$0xff]   ;;  %v5016_v24 = vld [vmem:[#allocation8 + $0x3c0] ss:$16 sps:$4 sm:$0xff]  }
 0x20f   :  { %2828 = vmatprep.subr.bf16.mxu0 %v4940_v37  ;;  %3000 = vmatprep.subr.bf16.mxu1 %v4943_v38  ;;  %v5001_v37 = vld [vmem:[#allocation8 + $0x368] ss:$16 sps:$4 sm:$0xff]   ;;  %v5006_v38 = vld [vmem:[#allocation8 + $0x384] ss:$16 sps:$4 sm:$0xff]   ;;  %v5021_v49 = vld [vmem:[#allocation8 + $0x3cc] ss:$16 sps:$4 sm:$0xff]  }
 0x210   :  { %2858 = vmatprep.mubr.bf16.mxu0 %v1220_v60  ;;  %3030 = vmatprep.mubr.bf16.mxu1 %v1220_v60  ;;  %v5018_v48 = vld [vmem:[#allocation8 + $0x3c4] ss:$16 sps:$4 sm:$0xff]   ;;  %v5019_v52 = vld [vmem:[#allocation8 + $0x3c8] ss:$16 sps:$4 sm:$0xff]   ;;  %v5027_v55 = vld [vmem:[#allocation8 + $0x3ec] ss:$16 sps:$4 sm:$0xff]  }
 0x212   :  { %2829 = vmatpush1.bf16.msra.mxu0 %v4938_v41  ;;  %3001 = vmatpush1.bf16.msra.mxu1 %v4941_v42  ;;  %v5007_v41 = vld [vmem:[#allocation8 + $0x388] ss:$16 sps:$4 sm:$0xff]   ;;  %v5012_v42 = vld [vmem:[#allocation8 + $0x3a4] ss:$16 sps:$4 sm:$0xff]  }
 0x213   :  { %2830 = vmatprep.subr.bf16.mxu0 %v4946_v45  ;;  %3002 = vmatprep.subr.bf16.mxu1 %v4949_v46  ;;  %v371_v45 = vsub.s32 5, %v6016_v12  ;;  %v5010_v46 = vld [vmem:[#allocation8 + $0x3a0] ss:$16 sps:$4 sm:$0xff]  }
 0x215   :  { %v372_v51 = vrot.slane %v6021_v14, %v371_v45  ;;  %v5046_v45 = vld [vmem:[#allocation8 + $0x460] ss:$16 sps:$4 sm:$0xff]  }
 0x216   :  { %2831 = vmatpush1.bf16.msra.mxu0 %v4944_v53  ;;  %3003 = vmatpush1.bf16.msra.mxu1 %v4947_v54  ;;  %v5024_v54 = vld [vmem:[#allocation8 + $0x3e4] ss:$16 sps:$4 sm:$0xff]  }
 0x217   :  { %2832 = vmatprep.subr.bf16.mxu0 %v4952_v56  ;;  %3004 = vmatprep.subr.bf16.mxu1 %v4955_v57 }
 0x21a   :  { %2833 = vmatpush1.bf16.msra.mxu0 %v4950_v61  ;;  %3005 = vmatpush1.bf16.msra.mxu1 %v4953_v62 }
 0x21b   :  { %2834 = vmatprep.subr.bf16.mxu0 %v4958_v63  ;;  %3006 = vmatprep.subr.bf16.mxu1 %v4961_v0  ;;  %v5022_v0 = vld [vmem:[#allocation8 + $0x3e0] ss:$16 sps:$4 sm:$0xff]  }
 0x21e   :  { %2835 = vmatpush1.bf16.msra.mxu0 %v4956_v1  ;;  %3007 = vmatpush1.bf16.msra.mxu1 %v4959_v2  ;;  %v5025_v1 = vld [vmem:[#allocation8 + $0x3e8] ss:$16 sps:$4 sm:$0xff]  }
 0x21f   :  { %2836 = vmatprep.subr.bf16.mxu0 %v4964_v3  ;;  %3008 = vmatprep.subr.bf16.mxu1 %v4967_v5  ;;  %v375_v5 = vsub.s32 6, %v6016_v12 }
 0x222   :  { %2837 = vmatpush1.bf16.msra.mxu0 %v4962_v6  ;;  %3009 = vmatpush1.bf16.msra.mxu1 %v4965_v7  ;;  %v5030_v6 = vld [vmem:[#allocation8 + $0x404] ss:$16 sps:$4 sm:$0xff]   ;;  %v5033_v7 = vld [vmem:[#allocation8 + $0x40c] ss:$16 sps:$4 sm:$0xff]  }
 0x223   :  { %2838 = vmatprep.subr.bf16.mxu0 %v4970_v8  ;;  %3010 = vmatprep.subr.bf16.mxu1 %v4973_v9  ;;  %v379_v9 = vsub.s32 7, %v6016_v12 }
 0x226   :  { %2839 = vmatpush1.bf16.msra.mxu0 %v4968_v10  ;;  %3011 = vmatpush1.bf16.msra.mxu1 %v4971_v11 }
 0x227   :  { %2840 = vmatprep.subr.bf16.mxu0 %v4976_v16  ;;  %3012 = vmatprep.subr.bf16.mxu1 %v4979_v17  ;;  %v5028_v16 = vld [vmem:[#allocation8 + $0x400] ss:$16 sps:$4 sm:$0xff]   ;;  %v5031_v17 = vld [vmem:[#allocation8 + $0x408] ss:$16 sps:$4 sm:$0xff]  }
 0x22a   :  { %2841 = vmatpush1.bf16.msra.mxu0 %v4974_v18  ;;  %3013 = vmatpush1.bf16.msra.mxu1 %v4977_v19  ;;  %v376_v19 = vrot.slane %v6021_v14, %v375_v5  ;;  %v5087_v5 = vld [vmem:[#allocation8 + $0x52c] ss:$16 sps:$4 sm:$0xff]  }
 0x22b   :  { %2842 = vmatprep.subr.bf16.mxu0 %v4982_v20  ;;  %3014 = vmatprep.subr.bf16.mxu1 %v4985_v21  ;;  %v5036_v20 = vld [vmem:[#allocation8 + $0x424] ss:$16 sps:$4 sm:$0xff]   ;;  %v5039_v21 = vld [vmem:[#allocation8 + $0x42c] ss:$16 sps:$4 sm:$0xff]  }
 0x22e   :  { %2843 = vmatpush1.bf16.msra.mxu0 %v4980_v22  ;;  %3015 = vmatpush1.bf16.msra.mxu1 %v4983_v23  ;;  %v380_v22 = vrot.slane %v6021_v14, %v379_v9  ;;  %v5093_v9 = vld [vmem:[#allocation8 + $0x54c] ss:$16 sps:$4 sm:$0xff]  }
 0x22f   :  { %2844 = vmatprep.subr.bf16.mxu0 %v4988_v25  ;;  %3016 = vmatprep.subr.bf16.mxu1 %v4991_v26  ;;  %v5034_v25 = vld [vmem:[#allocation8 + $0x420] ss:$16 sps:$4 sm:$0xff]   ;;  %v5037_v26 = vld [vmem:[#allocation8 + $0x428] ss:$16 sps:$4 sm:$0xff]  }
 0x232   :  { %2845 = vmatpush1.bf16.msra.mxu0 %v4986_v28  ;;  %3017 = vmatpush1.bf16.msra.mxu1 %v4989_v29 }
 0x233   :  { %2846 = vmatprep.subr.bf16.mxu0 %v4994_v31  ;;  %3018 = vmatprep.subr.bf16.mxu1 %v4997_v32  ;;  %v5042_v31 = vld [vmem:[#allocation8 + $0x444] ss:$16 sps:$4 sm:$0xff]   ;;  %v5045_v32 = vld [vmem:[#allocation8 + $0x44c] ss:$16 sps:$4 sm:$0xff]  }
 0x236   :  { %2847 = vmatpush1.bf16.msra.mxu0 %v4992_v4  ;;  %3019 = vmatpush1.bf16.msra.mxu1 %v4995_v33 }
 0x237   :  { %2848 = vmatprep.subr.bf16.mxu0 %v5000_v34  ;;  %3020 = vmatprep.subr.bf16.mxu1 %v5003_v35 }
 0x23a   :  { %2849 = vmatpush1.bf16.msra.mxu0 %v4998_v36  ;;  %3021 = vmatpush1.bf16.msra.mxu1 %v5001_v37  ;;  %v5040_v37 = vld [vmem:[#allocation8 + $0x440] ss:$16 sps:$4 sm:$0xff]  }
 0x23b   :  { %2850 = vmatprep.subr.bf16.mxu0 %v5006_v38  ;;  %3022 = vmatprep.subr.bf16.mxu1 %v5009_v39  ;;  %v5043_v38 = vld [vmem:[#allocation8 + $0x448] ss:$16 sps:$4 sm:$0xff]  }
 0x23e   :  { %2851 = vmatpush1.bf16.msra.mxu0 %v5004_v40  ;;  %3023 = vmatpush1.bf16.msra.mxu1 %v5007_v41  ;;  %v5048_v40 = vld [vmem:[#allocation8 + $0x464] ss:$16 sps:$4 sm:$0xff]   ;;  %v5051_v41 = vld [vmem:[#allocation8 + $0x46c] ss:$16 sps:$4 sm:$0xff]  }
 0x23f   :  { %2852 = vmatprep.subr.bf16.mxu0 %v5012_v42  ;;  %3024 = vmatprep.subr.bf16.mxu1 %v5015_v43 }
 0x242   :  { %2853 = vmatpush1.bf16.msra.mxu0 %v5010_v46  ;;  %3025 = vmatpush1.bf16.msra.mxu1 %v5013_v47  ;;  %v1149_v53 = vpop.f32.mrb[4].mxu0  ;;  %v5049_v46 = vld [vmem:[#allocation8 + $0x468] ss:$16 sps:$4 sm:$0xff]   ;;  %v5054_v47 = vld [vmem:[#allocation8 + $0x484] ss:$16 sps:$4 sm:$0xff]  }
 0x243   :  { %2854 = vmatprep.subr.bf16.mxu0 %v5018_v48  ;;  %3026 = vmatprep.subr.bf16.mxu1 %v5021_v49  ;;  %v1150_v56 = vadd.f32 %v1149_v53, %v368_v50  ;;  %v1151_v57 = vpop.f32.mrb[5].mxu0  ;;  %v5057_v48 = vld [vmem:[#allocation8 + $0x48c] ss:$16 sps:$4 sm:$0xff]   ;;  %v5052_v49 = vld [vmem:[#allocation8 + $0x480] ss:$16 sps:$4 sm:$0xff]  }
 0x244   :  { %v1152_v58 = vadd.f32 %v1151_v57, %v372_v51  ;;  %v1153_v60 = vpop.f32.mrb[6].mxu0  ;;  %v1192_v23 = vpop.f32.mrb[4].mxu1  ;;  %v5061_v53 = vld [vmem:[#allocation8 + $0x4a8] ss:$16 sps:$4 sm:$0xff]  }
 0x245   :  { %v1205_v61 = vmax.f32 %v1150_v56, 0.0  ;;  %v1154_v62 = vadd.f32 %v1153_v60, %v368_v50  ;;  %v1155_v63 = vpop.f32.mrb[7].mxu0  ;;  %v1193_v28 = vadd.f32 %v1192_v23, %v376_v19  ;;  %v1194_v29 = vpop.f32.mrb[5].mxu1  ;;  %v5055_v50 = vld [vmem:[#allocation8 + $0x488] ss:$16 sps:$4 sm:$0xff]  }
 0x246   :  { %2855 = vmatpush1.bf16.msra.mxu0 %v5016_v24  ;;  %3027 = vmatpush1.bf16.msra.mxu1 %v5019_v52  ;;  %v1206_v2 = vmax.f32 %v1152_v58, 0.0  ;;  %v1156_v3 = vadd.f32 %v1155_v63, %v372_v51  ;;  %v1195_v4 = vadd.f32 %v1194_v29, %v380_v22  ;;  %v1196_v33 = vpop.f32.mrb[6].mxu1  ;;  %v5060_v51 = vld [vmem:[#allocation8 + $0x4a4] ss:$16 sps:$4 sm:$0xff]   ;;  %v5063_v24 = vld [vmem:[#allocation8 + $0x4ac] ss:$16 sps:$4 sm:$0xff]  }
 0x247   :  { %2856 = vmatprep.subr.bf16.mxu0 %v5024_v54  ;;  %3028 = vmatprep.subr.bf16.mxu1 %v5027_v55  ;;  %v1213_v8 = vmax.f32 %v1154_v62, 0.0  ;;  %v1207_v14 = vmax.f32 %v1193_v28, 0.0  ;;  %v1197_v34 = vadd.f32 %v1196_v33, %v376_v19  ;;  %v1198_v35 = vpop.f32.mrb[7].mxu1  ;;  %v5058_v52 = vld [vmem:[#allocation8 + $0x4a0] ss:$16 sps:$4 sm:$0xff]  }
 0x248   :  { %v1214_v10 = vmax.f32 %v1156_v3, 0.0  ;;  %v1208_v36 = vmax.f32 %v1195_v4, 0.0  ;;  %v5066_v54 = vld [vmem:[#allocation8 + $0x4c4] ss:$16 sps:$4 sm:$0xff]   ;;  %v5069_v55 = vld [vmem:[#allocation8 + $0x4cc] ss:$16 sps:$4 sm:$0xff]  }
 0x249   :  { %v6046_v11 = vpack.c.bf16 %v1213_v8, %v1205_v61  ;;  %v1215_v39 = vmax.f32 %v1197_v34, 0.0  ;;  %v5064_v56 = vld [vmem:[#allocation8 + $0x4c0] ss:$16 sps:$4 sm:$0xff]   ;;  %v5067_v57 = vld [vmem:[#allocation8 + $0x4c8] ss:$16 sps:$4 sm:$0xff]  }
 0x24a   :  { %2857 = vmatpush1.bf16.msra.mxu0 %v5022_v0  ;;  %3029 = vmatpush1.bf16.msra.mxu1 %v5025_v1  ;;  %v1222_v18 = vpack.c.bf16 %v1214_v10, %v1206_v2  ;;  %v5072_v58 = vld [vmem:[#allocation8 + $0x4e4] ss:$16 sps:$4 sm:$0xff]   ;;  %v5075_v60 = vld [vmem:[#allocation8 + $0x4ec] ss:$16 sps:$4 sm:$0xff]   ;;  %v5070_v61 = vld [vmem:[#allocation8 + $0x4e0] ss:$16 sps:$4 sm:$0xff]  }
 0x24b   :  { %2869 = vmatprep.subr.bf16.mxu0 %v5030_v6  ;;  %3041 = vmatprep.subr.bf16.mxu1 %v5033_v7  ;;  %v6052_v43 = vpack.c.bf16 %v1215_v39, %v1207_v14  ;;  %v5073_v62 = vld [vmem:[#allocation8 + $0x4e8] ss:$16 sps:$4 sm:$0xff]   ;;  %v5078_v63 = vld [vmem:[#allocation8 + $0x504] ss:$16 sps:$4 sm:$0xff]   ;;  %v5081_v0 = vld [vmem:[#allocation8 + $0x50c] ss:$16 sps:$4 sm:$0xff]  }
 0x24c   :  { %v5076_v1 = vld [vmem:[#allocation8 + $0x500] ss:$16 sps:$4 sm:$0xff]   ;;  %v5079_v2 = vld [vmem:[#allocation8 + $0x508] ss:$16 sps:$4 sm:$0xff]   ;;  %v5084_v3 = vld [vmem:[#allocation8 + $0x524] ss:$16 sps:$4 sm:$0xff]  }
 0x24d   :  { %2859 = vmatmul.mubr.bf16.vlgmr.msra.gmra.mrb[8].mxu0 %v6038_v59  ;;  %3031 = vmatmul.mubr.bf16.vlgmr.msra.gmra.mrb[8].mxu1 %v6038_v59  ;;  %v1199_v59 = vadd.f32 %v1198_v35, %v380_v22  ;;  %v5082_v6 = vld [vmem:[#allocation8 + $0x520] ss:$16 sps:$4 sm:$0xff]   ;;  %v5085_v7 = vld [vmem:[#allocation8 + $0x528] ss:$16 sps:$4 sm:$0xff]   ;;  %v5090_v8 = vld [vmem:[#allocation8 + $0x544] ss:$16 sps:$4 sm:$0xff]  }
 0x24e   :  { %2870 = vmatpush1.bf16.msra.mxu0 %v5028_v16  ;;  %3042 = vmatpush1.bf16.msra.mxu1 %v5031_v17  ;;  %v5088_v10 = vld [vmem:[#allocation8 + $0x540] ss:$16 sps:$4 sm:$0xff]   ;;  %v5091_v16 = vld [vmem:[#allocation8 + $0x548] ss:$16 sps:$4 sm:$0xff]   ;;  %v5096_v17 = vld [vmem:[#allocation8 + $0x564] ss:$16 sps:$4 sm:$0xff]  }
 0x24f   :  { %2871 = vmatprep.subr.bf16.mxu0 %v5036_v20  ;;  %3043 = vmatprep.subr.bf16.mxu1 %v5039_v21  ;;  %v1216_v42 = vmax.f32 %v1199_v59, 0.0  ;;  %v5094_v19 = vld [vmem:[#allocation8 + $0x560] ss:$16 sps:$4 sm:$0xff]   ;;  %v5097_v20 = vld [vmem:[#allocation8 + $0x568] ss:$16 sps:$4 sm:$0xff]  }
 0x250   :  { %2901 = vmatprep.mubr.bf16.mxu0 %v1222_v18  ;;  %3073 = vmatprep.mubr.bf16.mxu1 %v1222_v18  ;;  %v5099_v18 = vld [vmem:[#allocation8 + $0x56c] ss:$16 sps:$4 sm:$0xff]   ;;  %v5102_v21 = vld [vmem:[#allocation8 + $0x584] ss:$16 sps:$4 sm:$0xff]   ;;  %v5100_v23 = vld [vmem:[#allocation8 + $0x580] ss:$16 sps:$4 sm:$0xff]  }
 0x251   :  { %v6054_v44 = vpack.c.bf16 %v1216_v42, %v1208_v36  ;;  %v5105_v22 = vld [vmem:[#allocation8 + $0x58c] ss:$16 sps:$4 sm:$0xff]   ;;  %v5106_v29 = vld [vmem:[#allocation8 + $0x5a0] ss:$16 sps:$4 sm:$0xff]   ;;  %v5115_v14 = vld [vmem:[#allocation8 + $0x5c8] ss:$16 sps:$4 sm:$0xff]  }
 0x252   :  { %2872 = vmatpush1.bf16.msra.mxu0 %v5034_v25  ;;  %3044 = vmatpush1.bf16.msra.mxu1 %v5037_v26  ;;  %v5103_v25 = vld [vmem:[#allocation8 + $0x588] ss:$16 sps:$4 sm:$0xff]   ;;  %v5108_v26 = vld [vmem:[#allocation8 + $0x5a4] ss:$16 sps:$4 sm:$0xff]   ;;  %v5111_v28 = vld [vmem:[#allocation8 + $0x5ac] ss:$16 sps:$4 sm:$0xff]  }
 0x253   :  { %2873 = vmatprep.subr.bf16.mxu0 %v5042_v31  ;;  %3045 = vmatprep.subr.bf16.mxu1 %v5045_v32  ;;  %v5109_v31 = vld [vmem:[#allocation8 + $0x5a8] ss:$16 sps:$4 sm:$0xff]   ;;  %v5114_v32 = vld [vmem:[#allocation8 + $0x5c4] ss:$16 sps:$4 sm:$0xff]   ;;  %v5117_v4 = vld [vmem:[#allocation8 + $0x5cc] ss:$16 sps:$4 sm:$0xff]  }
 0x254   :  { %v5112_v33 = vld [vmem:[#allocation8 + $0x5c0] ss:$16 sps:$4 sm:$0xff]   ;;  %v5120_v34 = vld [vmem:[#allocation8 + $0x5e4] ss:$16 sps:$4 sm:$0xff]   ;;  %v5123_v35 = vld [vmem:[#allocation8 + $0x5ec] ss:$16 sps:$4 sm:$0xff]  }
 0x255   :  { %v5118_v36 = vld [vmem:[#allocation8 + $0x5e0] ss:$16 sps:$4 sm:$0xff]   ;;  %v5121_v59 = vld [vmem:[#allocation8 + $0x5e8] ss:$16 sps:$4 sm:$0xff]   ;;  %v5135_v42 = vld [vmem:[#allocation8 + $0x62c] ss:$16 sps:$4 sm:$0xff]  }
 0x256   :  { %2874 = vmatpush1.bf16.msra.mxu0 %v5040_v37  ;;  %3046 = vmatpush1.bf16.msra.mxu1 %v5043_v38  ;;  %v5126_v37 = vld [vmem:[#allocation8 + $0x604] ss:$16 sps:$4 sm:$0xff]   ;;  %v5129_v38 = vld [vmem:[#allocation8 + $0x60c] ss:$16 sps:$4 sm:$0xff]   ;;  %v5124_v39 = vld [vmem:[#allocation8 + $0x600] ss:$16 sps:$4 sm:$0xff]  }
 0x257   :  { %2875 = vmatprep.subr.bf16.mxu0 %v5048_v40  ;;  %3047 = vmatprep.subr.bf16.mxu1 %v5051_v41  ;;  %v5127_v40 = vld [vmem:[#allocation8 + $0x608] ss:$16 sps:$4 sm:$0xff]   ;;  %v5132_v41 = vld [vmem:[#allocation8 + $0x624] ss:$16 sps:$4 sm:$0xff]  }
 0x25a   :  { %2876 = vmatpush1.bf16.msra.mxu0 %v5046_v45  ;;  %3048 = vmatpush1.bf16.msra.mxu1 %v5049_v46  ;;  %v5130_v45 = vld [vmem:[#allocation8 + $0x620] ss:$16 sps:$4 sm:$0xff]   ;;  %v5133_v46 = vld [vmem:[#allocation8 + $0x628] ss:$16 sps:$4 sm:$0xff]  }
 0x25b   :  { %2877 = vmatprep.subr.bf16.mxu0 %v5054_v47  ;;  %3049 = vmatprep.subr.bf16.mxu1 %v5057_v48  ;;  %v5138_v47 = vld [vmem:[#allocation8 + $0x644] ss:$16 sps:$4 sm:$0xff]   ;;  %v5141_v48 = vld [vmem:[#allocation8 + $0x64c] ss:$16 sps:$4 sm:$0xff]  }
 0x25e   :  { %2878 = vmatpush1.bf16.msra.mxu0 %v5052_v49  ;;  %3050 = vmatpush1.bf16.msra.mxu1 %v5055_v50  ;;  %v5136_v49 = vld [vmem:[#allocation8 + $0x640] ss:$16 sps:$4 sm:$0xff]   ;;  %v5139_v50 = vld [vmem:[#allocation8 + $0x648] ss:$16 sps:$4 sm:$0xff]  }
 0x25f   :  { %2879 = vmatprep.subr.bf16.mxu0 %v5060_v51  ;;  %3051 = vmatprep.subr.bf16.mxu1 %v5063_v24  ;;  %v5144_v51 = vld [vmem:[#allocation8 + $0x664] ss:$16 sps:$4 sm:$0xff]   ;;  %v5142_v24 = vld [vmem:[#allocation8 + $0x660] ss:$16 sps:$4 sm:$0xff]  }
 0x262   :  { %2880 = vmatpush1.bf16.msra.mxu0 %v5058_v52  ;;  %3052 = vmatpush1.bf16.msra.mxu1 %v5061_v53  ;;  %v5145_v52 = vld [vmem:[#allocation8 + $0x668] ss:$16 sps:$4 sm:$0xff]   ;;  %v5150_v53 = vld [vmem:[#allocation8 + $0x684] ss:$16 sps:$4 sm:$0xff]  }
 0x263   :  { %2881 = vmatprep.subr.bf16.mxu0 %v5066_v54  ;;  %3053 = vmatprep.subr.bf16.mxu1 %v5069_v55  ;;  %v5153_v54 = vld [vmem:[#allocation8 + $0x68c] ss:$16 sps:$4 sm:$0xff]   ;;  %v5148_v55 = vld [vmem:[#allocation8 + $0x680] ss:$16 sps:$4 sm:$0xff]  }
 0x266   :  { %2882 = vmatpush1.bf16.msra.mxu0 %v5064_v56  ;;  %3054 = vmatpush1.bf16.msra.mxu1 %v5067_v57  ;;  %v5156_v56 = vld [vmem:[#allocation8 + $0x6a4] ss:$16 sps:$4 sm:$0xff]   ;;  %v5159_v57 = vld [vmem:[#allocation8 + $0x6ac] ss:$16 sps:$4 sm:$0xff]  }
 0x267   :  { %2883 = vmatprep.subr.bf16.mxu0 %v5072_v58  ;;  %3055 = vmatprep.subr.bf16.mxu1 %v5075_v60  ;;  %v5154_v58 = vld [vmem:[#allocation8 + $0x6a0] ss:$16 sps:$4 sm:$0xff]   ;;  %v5157_v60 = vld [vmem:[#allocation8 + $0x6a8] ss:$16 sps:$4 sm:$0xff]  }
 0x26a   :  { %2884 = vmatpush1.bf16.msra.mxu0 %v5070_v61  ;;  %3056 = vmatpush1.bf16.msra.mxu1 %v5073_v62  ;;  %v5162_v61 = vld [vmem:[#allocation8 + $0x6c4] ss:$16 sps:$4 sm:$0xff]   ;;  %v5165_v62 = vld [vmem:[#allocation8 + $0x6cc] ss:$16 sps:$4 sm:$0xff]  }
 0x26b   :  { %2885 = vmatprep.subr.bf16.mxu0 %v5078_v63  ;;  %3057 = vmatprep.subr.bf16.mxu1 %v5081_v0  ;;  %v5160_v63 = vld [vmem:[#allocation8 + $0x6c0] ss:$16 sps:$4 sm:$0xff]   ;;  %v5163_v0 = vld [vmem:[#allocation8 + $0x6c8] ss:$16 sps:$4 sm:$0xff]  }
 0x26e   :  { %2886 = vmatpush1.bf16.msra.mxu0 %v5076_v1  ;;  %3058 = vmatpush1.bf16.msra.mxu1 %v5079_v2  ;;  %v5168_v1 = vld [vmem:[#allocation8 + $0x6e4] ss:$16 sps:$4 sm:$0xff]   ;;  %v5171_v2 = vld [vmem:[#allocation8 + $0x6ec] ss:$16 sps:$4 sm:$0xff]  }
 0x26f   :  { %2887 = vmatprep.subr.bf16.mxu0 %v5084_v3  ;;  %3059 = vmatprep.subr.bf16.mxu1 %v5087_v5  ;;  %v5166_v3 = vld [vmem:[#allocation8 + $0x6e0] ss:$16 sps:$4 sm:$0xff]   ;;  %v5169_v5 = vld [vmem:[#allocation8 + $0x6e8] ss:$16 sps:$4 sm:$0xff]  }
 0x272   :  { %2888 = vmatpush1.bf16.msra.mxu0 %v5082_v6  ;;  %3060 = vmatpush1.bf16.msra.mxu1 %v5085_v7  ;;  %v5174_v6 = vld [vmem:[#allocation8 + $0x704] ss:$16 sps:$4 sm:$0xff]   ;;  %v5177_v7 = vld [vmem:[#allocation8 + $0x70c] ss:$16 sps:$4 sm:$0xff]  }
 0x273   :  { %2889 = vmatprep.subr.bf16.mxu0 %v5090_v8  ;;  %3061 = vmatprep.subr.bf16.mxu1 %v5093_v9  ;;  %v5172_v8 = vld [vmem:[#allocation8 + $0x700] ss:$16 sps:$4 sm:$0xff]   ;;  %v5175_v9 = vld [vmem:[#allocation8 + $0x708] ss:$16 sps:$4 sm:$0xff]  }
 0x276   :  { %2890 = vmatpush1.bf16.msra.mxu0 %v5088_v10  ;;  %3062 = vmatpush1.bf16.msra.mxu1 %v5091_v16  ;;  %v5180_v10 = vld [vmem:[#allocation8 + $0x724] ss:$16 sps:$4 sm:$0xff]   ;;  %v5183_v16 = vld [vmem:[#allocation8 + $0x72c] ss:$16 sps:$4 sm:$0xff]  }
 0x277   :  { %2891 = vmatprep.subr.bf16.mxu0 %v5096_v17  ;;  %3063 = vmatprep.subr.bf16.mxu1 %v5099_v18  ;;  %v5178_v17 = vld [vmem:[#allocation8 + $0x720] ss:$16 sps:$4 sm:$0xff]   ;;  %v5181_v18 = vld [vmem:[#allocation8 + $0x728] ss:$16 sps:$4 sm:$0xff]  }
 0x27a   :  { %2892 = vmatpush1.bf16.msra.mxu0 %v5094_v19  ;;  %3064 = vmatpush1.bf16.msra.mxu1 %v5097_v20  ;;  %v5186_v19 = vld [vmem:[#allocation8 + $0x744] ss:$16 sps:$4 sm:$0xff]   ;;  %v5189_v20 = vld [vmem:[#allocation8 + $0x74c] ss:$16 sps:$4 sm:$0xff]  }
 0x27b   :  { %2893 = vmatprep.subr.bf16.mxu0 %v5102_v21  ;;  %3065 = vmatprep.subr.bf16.mxu1 %v5105_v22  ;;  %v5184_v21 = vld [vmem:[#allocation8 + $0x740] ss:$16 sps:$4 sm:$0xff]   ;;  %v5187_v22 = vld [vmem:[#allocation8 + $0x748] ss:$16 sps:$4 sm:$0xff]  }
 0x27e   :  { %2894 = vmatpush1.bf16.msra.mxu0 %v5100_v23  ;;  %3066 = vmatpush1.bf16.msra.mxu1 %v5103_v25  ;;  %v5192_v23 = vld [vmem:[#allocation8 + $0x764] ss:$16 sps:$4 sm:$0xff]   ;;  %v5195_v25 = vld [vmem:[#allocation8 + $0x76c] ss:$16 sps:$4 sm:$0xff]  }
 0x27f   :  { %2895 = vmatprep.subr.bf16.mxu0 %v5108_v26  ;;  %3067 = vmatprep.subr.bf16.mxu1 %v5111_v28  ;;  %v5190_v26 = vld [vmem:[#allocation8 + $0x760] ss:$16 sps:$4 sm:$0xff]   ;;  %v5193_v28 = vld [vmem:[#allocation8 + $0x768] ss:$16 sps:$4 sm:$0xff]  }
 0x282   :  { %2896 = vmatpush1.bf16.msra.mxu0 %v5106_v29  ;;  %3068 = vmatpush1.bf16.msra.mxu1 %v5109_v31  ;;  %v5198_v29 = vld [vmem:[#allocation8 + $0x784] ss:$16 sps:$4 sm:$0xff]   ;;  %v5201_v31 = vld [vmem:[#allocation8 + $0x78c] ss:$16 sps:$4 sm:$0xff]  }
 0x283   :  { %2897 = vmatprep.subr.bf16.mxu0 %v5114_v32  ;;  %3069 = vmatprep.subr.bf16.mxu1 %v5117_v4  ;;  %v5196_v32 = vld [vmem:[#allocation8 + $0x780] ss:$16 sps:$4 sm:$0xff]   ;;  %v5199_v4 = vld [vmem:[#allocation8 + $0x788] ss:$16 sps:$4 sm:$0xff]  }
 0x286   :  { %2898 = vmatpush1.bf16.msra.mxu0 %v5112_v33  ;;  %3070 = vmatpush1.bf16.msra.mxu1 %v5115_v14  ;;  %v5204_v33 = vld [vmem:[#allocation8 + $0x7a4] ss:$16 sps:$4 sm:$0xff]   ;;  %v5207_v14 = vld [vmem:[#allocation8 + $0x7ac] ss:$16 sps:$4 sm:$0xff]  }
 0x287   :  { %2899 = vmatprep.subr.bf16.mxu0 %v5120_v34  ;;  %3071 = vmatprep.subr.bf16.mxu1 %v5123_v35  ;;  %v5202_v34 = vld [vmem:[#allocation8 + $0x7a0] ss:$16 sps:$4 sm:$0xff]   ;;  %v5205_v35 = vld [vmem:[#allocation8 + $0x7a8] ss:$16 sps:$4 sm:$0xff]  }
 0x28a   :  { %2900 = vmatpush1.bf16.msra.mxu0 %v5118_v36  ;;  %3072 = vmatpush1.bf16.msra.mxu1 %v5121_v59  ;;  %v5210_v36 = vld [vmem:[#allocation8 + $0x7c4] ss:$16 sps:$4 sm:$0xff]   ;;  %v5213_v59 = vld [vmem:[#allocation8 + $0x7cc] ss:$16 sps:$4 sm:$0xff]  }
 0x28b   :  { %2912 = vmatprep.subr.bf16.mxu0 %v5126_v37  ;;  %3084 = vmatprep.subr.bf16.mxu1 %v5129_v38  ;;  %v5208_v37 = vld [vmem:[#allocation8 + $0x7c0] ss:$16 sps:$4 sm:$0xff]   ;;  %v5211_v38 = vld [vmem:[#allocation8 + $0x7c8] ss:$16 sps:$4 sm:$0xff]  }
 0x28d   :  { %2902 = vmatmul.mubr.bf16.vlgmr.msra.gmra.mrb[8].mxu0 %v6046_v11  ;;  %3074 = vmatmul.mubr.bf16.vlgmr.msra.gmra.mrb[8].mxu1 %v6046_v11  ;;  %v5147_v11 = vld [vmem:[#allocation8 + $0x66c] ss:$16 sps:$4 sm:$0xff]  }
 0x28e   :  { %2913 = vmatpush1.bf16.msra.mxu0 %v5124_v39  ;;  %3085 = vmatpush1.bf16.msra.mxu1 %v5127_v40  ;;  %v5216_v39 = vld [vmem:[#allocation8 + $0x7e4] ss:$16 sps:$4 sm:$0xff]   ;;  %v5219_v40 = vld [vmem:[#allocation8 + $0x7ec] ss:$16 sps:$4 sm:$0xff]  }
 0x28f   :  { %2914 = vmatprep.subr.bf16.mxu0 %v5132_v41  ;;  %3086 = vmatprep.subr.bf16.mxu1 %v5135_v42  ;;  %v5214_v41 = vld [vmem:[#allocation8 + $0x7e0] ss:$16 sps:$4 sm:$0xff]   ;;  %v5217_v42 = vld [vmem:[#allocation8 + $0x7e8] ss:$16 sps:$4 sm:$0xff]  }
 0x290   :  { %2944 = vmatprep.mubr.bf16.mxu0 %v6054_v44  ;;  %3116 = vmatprep.mubr.bf16.mxu1 %v6054_v44  ;;  %v5151_v44 = vld [vmem:[#allocation8 + $0x688] ss:$16 sps:$4 sm:$0xff]  }
 0x292   :  { %2915 = vmatpush1.bf16.msra.mxu0 %v5130_v45  ;;  %3087 = vmatpush1.bf16.msra.mxu1 %v5133_v46  ;;  %v5222_v45 = vld [vmem:[#allocation11 + $0x4] ss:$8 sps:$4 sm:$0xff]   ;;  %v5220_v46 = vld [vmem:[#allocation11] ss:$8 sps:$4 sm:$0xff]  }
 0x293   :  { %2916 = vmatprep.subr.bf16.mxu0 %v5138_v47  ;;  %3088 = vmatprep.subr.bf16.mxu1 %v5141_v48  ;;  %v5225_v47 = vld [vmem:[#allocation11 + $0x14] ss:$8 sps:$4 sm:$0xff]   ;;  %v5223_v48 = vld [vmem:[#allocation11 + $0x10] ss:$8 sps:$4 sm:$0xff]  }
 0x296   :  { %2917 = vmatpush1.bf16.msra.mxu0 %v5136_v49  ;;  %3089 = vmatpush1.bf16.msra.mxu1 %v5139_v50  ;;  %v5228_v49 = vld [vmem:[#allocation11 + $0x24] ss:$8 sps:$4 sm:$0xff]   ;;  %v5226_v50 = vld [vmem:[#allocation11 + $0x20] ss:$8 sps:$4 sm:$0xff]  }
 0x297   :  { %2918 = vmatprep.subr.bf16.mxu0 %v5144_v51  ;;  %3090 = vmatprep.subr.bf16.mxu1 %v5147_v11  ;;  %v5231_v51 = vld [vmem:[#allocation11 + $0x34] ss:$8 sps:$4 sm:$0xff]   ;;  %v5229_v11 = vld [vmem:[#allocation11 + $0x30] ss:$8 sps:$4 sm:$0xff]  }
 0x29a   :  { %2919 = vmatpush1.bf16.msra.mxu0 %v5142_v24  ;;  %3091 = vmatpush1.bf16.msra.mxu1 %v5145_v52  ;;  %v5234_v24 = vld [vmem:[#allocation11 + $0x44] ss:$8 sps:$4 sm:$0xff]   ;;  %v5232_v52 = vld [vmem:[#allocation11 + $0x40] ss:$8 sps:$4 sm:$0xff]  }
 0x29b   :  { %2920 = vmatprep.subr.bf16.mxu0 %v5150_v53  ;;  %3092 = vmatprep.subr.bf16.mxu1 %v5153_v54  ;;  %v5237_v53 = vld [vmem:[#allocation11 + $0x54] ss:$8 sps:$4 sm:$0xff]   ;;  %v5235_v54 = vld [vmem:[#allocation11 + $0x50] ss:$8 sps:$4 sm:$0xff]  }
 0x29e   :  { %2921 = vmatpush1.bf16.msra.mxu0 %v5148_v55  ;;  %3093 = vmatpush1.bf16.msra.mxu1 %v5151_v44  ;;  %v5238_v55 = vld [vmem:[#allocation11 + $0x60] ss:$8 sps:$4 sm:$0xff]   ;;  %v5243_v44 = vld [vmem:[#allocation11 + $0x74] ss:$8 sps:$4 sm:$0xff]  }
 0x29f   :  { %2922 = vmatprep.subr.bf16.mxu0 %v5156_v56  ;;  %3094 = vmatprep.subr.bf16.mxu1 %v5159_v57  ;;  %v5241_v56 = vld [vmem:[#allocation11 + $0x70] ss:$8 sps:$4 sm:$0xff]   ;;  %v5246_v57 = vld [vmem:[#allocation11 + $0x84] ss:$8 sps:$4 sm:$0xff]  }
 0x2a2   :  { %2923 = vmatpush1.bf16.msra.mxu0 %v5154_v58  ;;  %3095 = vmatpush1.bf16.msra.mxu1 %v5157_v60  ;;  %v5244_v58 = vld [vmem:[#allocation11 + $0x80] ss:$8 sps:$4 sm:$0xff]   ;;  %v5249_v60 = vld [vmem:[#allocation11 + $0x94] ss:$8 sps:$4 sm:$0xff]  }
 0x2a3   :  { %2924 = vmatprep.subr.bf16.mxu0 %v5162_v61  ;;  %3096 = vmatprep.subr.bf16.mxu1 %v5165_v62  ;;  %v5247_v61 = vld [vmem:[#allocation11 + $0x90] ss:$8 sps:$4 sm:$0xff]   ;;  %v5252_v62 = vld [vmem:[#allocation11 + $0xa4] ss:$8 sps:$4 sm:$0xff]  }
 0x2a6   :  { %2925 = vmatpush1.bf16.msra.mxu0 %v5160_v63  ;;  %3097 = vmatpush1.bf16.msra.mxu1 %v5163_v0  ;;  %v5250_v63 = vld [vmem:[#allocation11 + $0xa0] ss:$8 sps:$4 sm:$0xff]   ;;  %v5255_v0 = vld [vmem:[#allocation11 + $0xb4] ss:$8 sps:$4 sm:$0xff]  }
 0x2a7   :  { %2926 = vmatprep.subr.bf16.mxu0 %v5168_v1  ;;  %3098 = vmatprep.subr.bf16.mxu1 %v5171_v2  ;;  %v5253_v1 = vld [vmem:[#allocation11 + $0xb0] ss:$8 sps:$4 sm:$0xff]   ;;  %v5258_v2 = vld [vmem:[#allocation11 + $0xc4] ss:$8 sps:$4 sm:$0xff]  }
 0x2aa   :  { %2927 = vmatpush1.bf16.msra.mxu0 %v5166_v3  ;;  %3099 = vmatpush1.bf16.msra.mxu1 %v5169_v5  ;;  %v5256_v3 = vld [vmem:[#allocation11 + $0xc0] ss:$8 sps:$4 sm:$0xff]   ;;  %v5261_v5 = vld [vmem:[#allocation11 + $0xd4] ss:$8 sps:$4 sm:$0xff]  }
 0x2ab   :  { %2928 = vmatprep.subr.bf16.mxu0 %v5174_v6  ;;  %3100 = vmatprep.subr.bf16.mxu1 %v5177_v7  ;;  %v5259_v6 = vld [vmem:[#allocation11 + $0xd0] ss:$8 sps:$4 sm:$0xff]   ;;  %v5264_v7 = vld [vmem:[#allocation11 + $0xe4] ss:$8 sps:$4 sm:$0xff]  }
 0x2ae   :  { %2929 = vmatpush1.bf16.msra.mxu0 %v5172_v8  ;;  %3101 = vmatpush1.bf16.msra.mxu1 %v5175_v9  ;;  %v5262_v8 = vld [vmem:[#allocation11 + $0xe0] ss:$8 sps:$4 sm:$0xff]   ;;  %v5267_v9 = vld [vmem:[#allocation11 + $0xf4] ss:$8 sps:$4 sm:$0xff]  }
 0x2af   :  { %2930 = vmatprep.subr.bf16.mxu0 %v5180_v10  ;;  %3102 = vmatprep.subr.bf16.mxu1 %v5183_v16  ;;  %v5265_v10 = vld [vmem:[#allocation11 + $0xf0] ss:$8 sps:$4 sm:$0xff]   ;;  %v5270_v16 = vld [vmem:[#allocation11 + $0x104] ss:$8 sps:$4 sm:$0xff]  }
 0x2b2   :  { %2931 = vmatpush1.bf16.msra.mxu0 %v5178_v17  ;;  %3103 = vmatpush1.bf16.msra.mxu1 %v5181_v18  ;;  %v5316_v17 = vld [vmem:[#allocation14] ss:$8 sps:$4 sm:$0xff]   ;;  %v5318_v18 = vld [vmem:[#allocation14 + $0x4] ss:$8 sps:$4 sm:$0xff]  }
 0x2b3   :  { %2932 = vmatprep.subr.bf16.mxu0 %v5186_v19  ;;  %3104 = vmatprep.subr.bf16.mxu1 %v5189_v20  ;;  %v5321_v19 = vld [vmem:[#allocation14 + $0x14] ss:$8 sps:$4 sm:$0xff]   ;;  %v5319_v20 = vld [vmem:[#allocation14 + $0x10] ss:$8 sps:$4 sm:$0xff]  }
 0x2b6   :  { %2933 = vmatpush1.bf16.msra.mxu0 %v5184_v21  ;;  %3105 = vmatpush1.bf16.msra.mxu1 %v5187_v22  ;;  %v5324_v21 = vld [vmem:[#allocation14 + $0x24] ss:$8 sps:$4 sm:$0xff]   ;;  %v5322_v22 = vld [vmem:[#allocation14 + $0x20] ss:$8 sps:$4 sm:$0xff]  }
 0x2b7   :  { %2934 = vmatprep.subr.bf16.mxu0 %v5192_v23  ;;  %3106 = vmatprep.subr.bf16.mxu1 %v5195_v25  ;;  %v5327_v23 = vld [vmem:[#allocation14 + $0x34] ss:$8 sps:$4 sm:$0xff]   ;;  %v5325_v25 = vld [vmem:[#allocation14 + $0x30] ss:$8 sps:$4 sm:$0xff]  }
 0x2ba   :  { %2935 = vmatpush1.bf16.msra.mxu0 %v5190_v26  ;;  %3107 = vmatpush1.bf16.msra.mxu1 %v5193_v28  ;;  %v5330_v26 = vld [vmem:[#allocation14 + $0x44] ss:$8 sps:$4 sm:$0xff]   ;;  %v5328_v28 = vld [vmem:[#allocation14 + $0x40] ss:$8 sps:$4 sm:$0xff]  }
 0x2bb   :  { %2936 = vmatprep.subr.bf16.mxu0 %v5198_v29  ;;  %3108 = vmatprep.subr.bf16.mxu1 %v5201_v31  ;;  %v5333_v29 = vld [vmem:[#allocation14 + $0x54] ss:$8 sps:$4 sm:$0xff]   ;;  %v5331_v31 = vld [vmem:[#allocation14 + $0x50] ss:$8 sps:$4 sm:$0xff]  }
 0x2be   :  { %2937 = vmatpush1.bf16.msra.mxu0 %v5196_v32  ;;  %3109 = vmatpush1.bf16.msra.mxu1 %v5199_v4  ;;  %v5336_v32 = vld [vmem:[#allocation14 + $0x64] ss:$8 sps:$4 sm:$0xff]   ;;  %v5334_v4 = vld [vmem:[#allocation14 + $0x60] ss:$8 sps:$4 sm:$0xff]  }
 0x2bf   :  { %2938 = vmatprep.subr.bf16.mxu0 %v5204_v33  ;;  %3110 = vmatprep.subr.bf16.mxu1 %v5207_v14  ;;  %v5339_v33 = vld [vmem:[#allocation14 + $0x74] ss:$8 sps:$4 sm:$0xff]   ;;  %v5337_v14 = vld [vmem:[#allocation14 + $0x70] ss:$8 sps:$4 sm:$0xff]  }
 0x2c2   :  { %2939 = vmatpush1.bf16.msra.mxu0 %v5202_v34  ;;  %3111 = vmatpush1.bf16.msra.mxu1 %v5205_v35  ;;  %v5342_v34 = vld [vmem:[#allocation14 + $0x84] ss:$8 sps:$4 sm:$0xff]   ;;  %v5340_v35 = vld [vmem:[#allocation14 + $0x80] ss:$8 sps:$4 sm:$0xff]  }
 0x2c3   :  { %2940 = vmatprep.subr.bf16.mxu0 %v5210_v36  ;;  %3112 = vmatprep.subr.bf16.mxu1 %v5213_v59  ;;  %v5345_v36 = vld [vmem:[#allocation14 + $0x94] ss:$8 sps:$4 sm:$0xff]   ;;  %v5343_v59 = vld [vmem:[#allocation14 + $0x90] ss:$8 sps:$4 sm:$0xff]  }
 0x2c6   :  { %2941 = vmatpush1.bf16.msra.mxu0 %v5208_v37  ;;  %3113 = vmatpush1.bf16.msra.mxu1 %v5211_v38  ;;  %v5348_v37 = vld [vmem:[#allocation14 + $0xa4] ss:$8 sps:$4 sm:$0xff]   ;;  %v5346_v38 = vld [vmem:[#allocation14 + $0xa0] ss:$8 sps:$4 sm:$0xff]  }
 0x2c7   :  { %2942 = vmatprep.subr.bf16.mxu0 %v5216_v39  ;;  %3114 = vmatprep.subr.bf16.mxu1 %v5219_v40  ;;  %v5351_v39 = vld [vmem:[#allocation14 + $0xb4] ss:$8 sps:$4 sm:$0xff]   ;;  %v5349_v40 = vld [vmem:[#allocation14 + $0xb0] ss:$8 sps:$4 sm:$0xff]  }
 0x2ca   :  { %2943 = vmatpush1.bf16.msra.mxu0 %v5214_v41  ;;  %3115 = vmatpush1.bf16.msra.mxu1 %v5217_v42  ;;  %v5354_v41 = vld [vmem:[#allocation14 + $0xc4] ss:$8 sps:$4 sm:$0xff]   ;;  %v1481_v42 = vld [vmem:[#allocation10] sm:$0xf] }
 0x2cb   :  { %3535 = vmatprep.subr.bf16.mxu0 %v5222_v45  ;;  %3831 = vmatprep.subr.bf16.mxu1 %v5318_v18  ;;  %v5352_v45 = vld [vmem:[#allocation14 + $0xc0] ss:$8 sps:$4 sm:$0xff]   ;;  %v5271_v18 = vld [vmem:[#allocation11 + $0x110] ss:$8 sps:$4 sm:$0xff]  }
 0x2cd   :  { %2945 = vmatmul.mubr.bf16.vlgmr.msra.gmra.mrb[8].mxu0 %v6052_v43  ;;  %3117 = vmatmul.mubr.bf16.vlgmr.msra.gmra.mrb[8].mxu1 %v6052_v43  ;;  %v5240_v43 = vld [vmem:[#allocation11 + $0x64] ss:$8 sps:$4 sm:$0xff]  }
 0x2ce   :  { %3536 = vmatpush1.bf16.msra.mxu0 %v5220_v46  ;;  %3832 = vmatpush1.bf16.msra.mxu1 %v5316_v17  ;;  %v5357_v46 = vld [vmem:[#allocation14 + $0xd4] ss:$8 sps:$4 sm:$0xff]  }
 0x2cf   :  { %3537 = vmatprep.subr.bf16.mxu0 %v5225_v47  ;;  %3833 = vmatprep.subr.bf16.mxu1 %v5321_v19  ;;  %v1486_v47 = vrot.slane %v1481_v42, %v6019_v13  ;;  %v5273_v17 = vld [vmem:[#allocation11 + $0x114] ss:$8 sps:$4 sm:$0xff]   ;;  %v5276_v19 = vld [vmem:[#allocation11 + $0x124] ss:$8 sps:$4 sm:$0xff]  }
 0x2d2   :  { %3538 = vmatpush1.bf16.msra.mxu0 %v5223_v48  ;;  %3834 = vmatpush1.bf16.msra.mxu1 %v5319_v20  ;;  %v1494_v48 = vrot.slane %v1481_v42, %v359_v27  ;;  %v5274_v20 = vld [vmem:[#allocation11 + $0x120] ss:$8 sps:$4 sm:$0xff]  }
 0x2d3   :  { %3539 = vmatprep.subr.bf16.mxu0 %v5228_v49  ;;  %3835 = vmatprep.subr.bf16.mxu1 %v5324_v21  ;;  %v1490_v49 = vrot.slane %v1481_v42, %v6024_v15  ;;  %v5279_v21 = vld [vmem:[#allocation11 + $0x134] ss:$8 sps:$4 sm:$0xff]  }
 0x2d6   :  { %3540 = vmatpush1.bf16.msra.mxu0 %v5226_v50  ;;  %3836 = vmatpush1.bf16.msra.mxu1 %v5322_v22  ;;  %v1498_v50 = vrot.slane %v1481_v42, %v363_v30  ;;  %v5277_v22 = vld [vmem:[#allocation11 + $0x130] ss:$8 sps:$4 sm:$0xff]  }
 0x2d7   :  { %3541 = vmatprep.subr.bf16.mxu0 %v5231_v51  ;;  %3837 = vmatprep.subr.bf16.mxu1 %v5327_v23  ;;  %v5355_v51 = vld [vmem:[#allocation14 + $0xd0] ss:$8 sps:$4 sm:$0xff]   ;;  %v5282_v23 = vld [vmem:[#allocation11 + $0x144] ss:$8 sps:$4 sm:$0xff]  }
 0x2d8   :  { %v5307_v42 = vld [vmem:[#allocation11 + $0x1d0] ss:$8 sps:$4 sm:$0xff]  }
 0x2da   :  { %3542 = vmatpush1.bf16.msra.mxu0 %v5229_v11  ;;  %3838 = vmatpush1.bf16.msra.mxu1 %v5325_v25  ;;  %v5280_v25 = vld [vmem:[#allocation11 + $0x140] ss:$8 sps:$4 sm:$0xff]  }
 0x2db   :  { %3543 = vmatprep.subr.bf16.mxu0 %v5234_v24  ;;  %3839 = vmatprep.subr.bf16.mxu1 %v5330_v26  ;;  %v5285_v26 = vld [vmem:[#allocation11 + $0x154] ss:$8 sps:$4 sm:$0xff]  }
 0x2de   :  { %3544 = vmatpush1.bf16.msra.mxu0 %v5232_v52  ;;  %3840 = vmatpush1.bf16.msra.mxu1 %v5328_v28  ;;  %v5283_v28 = vld [vmem:[#allocation11 + $0x150] ss:$8 sps:$4 sm:$0xff]  }
 0x2df   :  { %3545 = vmatprep.subr.bf16.mxu0 %v5237_v53  ;;  %3841 = vmatprep.subr.bf16.mxu1 %v5333_v29  ;;  %v5288_v29 = vld [vmem:[#allocation11 + $0x164] ss:$8 sps:$4 sm:$0xff]  }
 0x2e2   :  { %3546 = vmatpush1.bf16.msra.mxu0 %v5235_v54  ;;  %3842 = vmatpush1.bf16.msra.mxu1 %v5331_v31  ;;  %v5286_v31 = vld [vmem:[#allocation11 + $0x160] ss:$8 sps:$4 sm:$0xff]  }
 0x2e3   :  { %3547 = vmatprep.subr.bf16.mxu0 %v5240_v43  ;;  %3843 = vmatprep.subr.bf16.mxu1 %v5336_v32  ;;  %v5291_v32 = vld [vmem:[#allocation11 + $0x174] ss:$8 sps:$4 sm:$0xff]  }
 0x2e6   :  { %3548 = vmatpush1.bf16.msra.mxu0 %v5238_v55  ;;  %3844 = vmatpush1.bf16.msra.mxu1 %v5334_v4  ;;  %v5289_v4 = vld [vmem:[#allocation11 + $0x170] ss:$8 sps:$4 sm:$0xff]  }
 0x2e7   :  { %3549 = vmatprep.subr.bf16.mxu0 %v5243_v44  ;;  %3845 = vmatprep.subr.bf16.mxu1 %v5339_v33  ;;  %v5294_v33 = vld [vmem:[#allocation11 + $0x184] ss:$8 sps:$4 sm:$0xff]  }
 0x2ea   :  { %3550 = vmatpush1.bf16.msra.mxu0 %v5241_v56  ;;  %3846 = vmatpush1.bf16.msra.mxu1 %v5337_v14  ;;  %v5292_v14 = vld [vmem:[#allocation11 + $0x180] ss:$8 sps:$4 sm:$0xff]  }
 0x2eb   :  { %3551 = vmatprep.subr.bf16.mxu0 %v5246_v57  ;;  %3847 = vmatprep.subr.bf16.mxu1 %v5342_v34  ;;  %v5297_v34 = vld [vmem:[#allocation11 + $0x194] ss:$8 sps:$4 sm:$0xff]  }
 0x2ee   :  { %3552 = vmatpush1.bf16.msra.mxu0 %v5244_v58  ;;  %3848 = vmatpush1.bf16.msra.mxu1 %v5340_v35  ;;  %v5295_v35 = vld [vmem:[#allocation11 + $0x190] ss:$8 sps:$4 sm:$0xff]  }
 0x2ef   :  { %3553 = vmatprep.subr.bf16.mxu0 %v5249_v60  ;;  %3849 = vmatprep.subr.bf16.mxu1 %v5345_v36  ;;  %v5300_v36 = vld [vmem:[#allocation11 + $0x1a4] ss:$8 sps:$4 sm:$0xff]  }
 0x2f2   :  { %3554 = vmatpush1.bf16.msra.mxu0 %v5247_v61  ;;  %3850 = vmatpush1.bf16.msra.mxu1 %v5343_v59  ;;  %v5298_v59 = vld [vmem:[#allocation11 + $0x1a0] ss:$8 sps:$4 sm:$0xff]  }
 0x2f3   :  { %3555 = vmatprep.subr.bf16.mxu0 %v5252_v62  ;;  %3851 = vmatprep.subr.bf16.mxu1 %v5348_v37  ;;  %v5303_v37 = vld [vmem:[#allocation11 + $0x1b4] ss:$8 sps:$4 sm:$0xff]  }
 0x2f6   :  { %3556 = vmatpush1.bf16.msra.mxu0 %v5250_v63  ;;  %3852 = vmatpush1.bf16.msra.mxu1 %v5346_v38  ;;  %v5301_v38 = vld [vmem:[#allocation11 + $0x1b0] ss:$8 sps:$4 sm:$0xff]  }
 0x2f7   :  { %3557 = vmatprep.subr.bf16.mxu0 %v5255_v0  ;;  %3853 = vmatprep.subr.bf16.mxu1 %v5351_v39  ;;  %v5306_v39 = vld [vmem:[#allocation11 + $0x1c4] ss:$8 sps:$4 sm:$0xff]  }
 0x2fa   :  { %3558 = vmatpush1.bf16.msra.mxu0 %v5253_v1  ;;  %3854 = vmatpush1.bf16.msra.mxu1 %v5349_v40  ;;  %v5304_v40 = vld [vmem:[#allocation11 + $0x1c0] ss:$8 sps:$4 sm:$0xff]  }
 0x2fb   :  { %3559 = vmatprep.subr.bf16.mxu0 %v5258_v2  ;;  %3855 = vmatprep.subr.bf16.mxu1 %v5354_v41  ;;  %v5309_v41 = vld [vmem:[#allocation11 + $0x1d4] ss:$8 sps:$4 sm:$0xff]  }
 0x2fe   :  { %3560 = vmatpush1.bf16.msra.mxu0 %v5256_v3  ;;  %3856 = vmatpush1.bf16.msra.mxu1 %v5352_v45  ;;  %v5312_v45 = vld [vmem:[#allocation11 + $0x1e4] ss:$8 sps:$4 sm:$0xff]  }
 0x2ff   :  { %3561 = vmatprep.subr.bf16.mxu0 %v5261_v5  ;;  %3857 = vmatprep.subr.bf16.mxu1 %v5357_v46  ;;  %v5310_v46 = vld [vmem:[#allocation11 + $0x1e0] ss:$8 sps:$4 sm:$0xff]  }
 0x302   :  { %3562 = vmatpush1.bf16.msra.mxu0 %v5259_v6  ;;  %3858 = vmatpush1.bf16.msra.mxu1 %v5355_v51  ;;  %v5363_v51 = vld [vmem:[#allocation14 + $0xf4] ss:$8 sps:$4 sm:$0xff]  }
 0x303   :  { %3563 = vmatprep.subr.bf16.mxu0 %v5264_v7 }
 0x306   :  { %3564 = vmatpush1.bf16.msra.mxu0 %v5262_v8 }
 0x307   :  { %3565 = vmatprep.subr.bf16.mxu0 %v5267_v9 }
 0x30a   :  { %3566 = vmatpush1.bf16.msra.mxu0 %v5265_v10 }
 0x30b   :  { %3578 = vmatprep.subr.bf16.mxu0 %v5270_v16  ;;  %v5268_v16 = vld [vmem:[#allocation11 + $0x100] ss:$8 sps:$4 sm:$0xff]  }
 0x3a0   :  { %v2946_v11 = vpop.f32.mrb[8].mxu0  ;;  %v3118_v24 = vpop.f32.mrb[8].mxu1 }
 0x3a1   :  { %v4771_v52 = vadd.f32 %v2946_v11, %v1486_v47  ;;  %v4775_v53 = vadd.f32 %v3118_v24, %v1494_v48  ;;  %v2948_v54 = vpop.f32.mrb[9].mxu0  ;;  %v3120_v43 = vpop.f32.mrb[9].mxu1  ;;  %v5361_v11 = vld [vmem:[#allocation14 + $0xf0] ss:$8 sps:$4 sm:$0xff]   ;;  %v5364_v24 = vld [vmem:[#allocation17 + $0x40] sm:$0xff]  }
 0x3a2   :  { %v4772_v55 = vadd.f32 %v2948_v54, %v1490_v49  ;;  %v4776_v44 = vadd.f32 %v3120_v43, %v1498_v50  ;;  %v2950_v56 = vpop.f32.mrb[10].mxu0  ;;  %v3122_v57 = vpop.f32.mrb[10].mxu1 }
 0x3a3   :  { %v4773_v27 = vadd.f32 %v2950_v56, %v1486_v47  ;;  %v4777_v58 = vadd.f32 %v3122_v57, %v1494_v48  ;;  %v2952_v60 = vpop.f32.mrb[11].mxu0  ;;  %v3124_v61 = vpop.f32.mrb[11].mxu1  ;;  %v3127_v62 = vmax.f32 %v4771_v52, 0.0  ;;  %v3129_v63 = vmax.f32 %v4775_v53, 0.0  ;;  %v5315_v47 = vld [vmem:[#allocation11 + $0x1f4] ss:$8 sps:$4 sm:$0xff]  }
 0x3a4   :  { %v4774_v12 = vadd.f32 %v2952_v60, %v1490_v49  ;;  %v4778_v30 = vadd.f32 %v3124_v61, %v1498_v50  ;;  %v3128_v2 = vmax.f32 %v4772_v55, 0.0  ;;  %v3130_v3 = vmax.f32 %v4776_v44, 0.0  ;;  %v5313_v48 = vld [vmem:[#allocation11 + $0x1f0] ss:$8 sps:$4 sm:$0xff]   ;;  %v5358_v50 = vld [vmem:[#allocation14 + $0xe0] ss:$8 sps:$4 sm:$0xff]  }
 0x3a5   :  { %v3131_v0 = vmax.f32 %v4773_v27, 0.0  ;;  %v3133_v1 = vmax.f32 %v4777_v58, 0.0  ;;  %v5360_v49 = vld [vmem:[#allocation14 + $0xe4] ss:$8 sps:$4 sm:$0xff]   ;;  %v3203_v52 = vld [vmem:[#allocation13] sm:$0x3] }
 0x3a6   :  { %v3132_v5 = vmax.f32 %v4774_v12, 0.0  ;;  %v3134_v6 = vmax.f32 %v4778_v30, 0.0  ;;  %3859 = vmatprep.subr.bf16.mxu1 %v5360_v49  ;;  %v3208_v53 = vrot.slane %v3203_v52, %v6019_v13  ;;  %v3212_v54 = vrot.slane %v3203_v52, %v6024_v15  ;;  %v4694_v49 = vld [vmem:[#allocation19] ss:$0 sm:$0xff] }
 0x3a7   :  { %v3135_v7 = vpack.c.bf16 %v3131_v0, %v3127_v62  ;;  %v6068_v8 = vpack.c.bf16 %v3133_v1, %v3129_v63  ;;  %3860 = vmatpush1.bf16.msra.mxu1 %v5358_v50  ;;  %v5365_v1 = vld [vmem:[#allocation17] sm:$0xff]  }
 0x3a8   :  { %v3136_v9 = vpack.c.bf16 %v3132_v5, %v3128_v2  ;;  %v3138_v10 = vpack.c.bf16 %v3134_v6, %v3130_v3  ;;  %3861 = vmatprep.subr.bf16.mxu1 %v5363_v51  ;;  %v5366_v2 = vld [vmem:[#allocation17 + $0x48] sm:$0xff]   ;;  %v5368_v5 = vld [vmem:[#allocation17 + $0x50] sm:$0xff]  }
 0x3a9   :  { %v5367_v3 = vld [vmem:[#allocation17 + $0x8] sm:$0xff]   ;;  %v5369_v6 = vld [vmem:[#allocation17 + $0x10] sm:$0xff]  }
 0x3aa   :  { %3567 = vmatprep.mubr.bf16.mxu0 %v3136_v9  ;;  %v5372_v9 = vld [vmem:[#allocation17 + $0x60] sm:$0xff]  }
 0x3ab   :  { %3568 = vmatmul.mubr.bf16.vlgmr.msra.gmra.mrb[12].mxu0 %v3135_v7  ;;  %3862 = vmatpush1.bf16.msra.mxu1 %v5361_v11  ;;  %v5370_v7 = vld [vmem:[#allocation17 + $0x58] sm:$0xff]  }
 0x3ac   :  { %3579 = vmatpush1.bf16.msra.mxu0 %v5268_v16  ;;  %3610 = vmatprep.mubr.bf16.mxu0 %v3138_v10  ;;  %v5373_v10 = vld [vmem:[#allocation17 + $0x20] sm:$0xff]   ;;  %v5374_v16 = vld [vmem:[#allocation17 + $0x68] sm:$0xff]  }
 0x3ad   :  { %3580 = vmatprep.subr.bf16.mxu0 %v5273_v17  ;;  %4720 = vmatprep.subr.bf16.mxu1 %v5364_v24  ;;  %v5375_v17 = vld [vmem:[#allocation17 + $0x28] sm:$0xff]  }
 0x3b0   :  { %3581 = vmatpush1.bf16.msra.mxu0 %v5271_v18  ;;  %v5376_v18 = vld [vmem:[#allocation17 + $0x70] sm:$0xff]  }
 0x3b1   :  { %3582 = vmatprep.subr.bf16.mxu0 %v5276_v19  ;;  %v5377_v19 = vld [vmem:[#allocation17 + $0x30] sm:$0xff]  }
 0x3b4   :  { %3583 = vmatpush1.bf16.msra.mxu0 %v5274_v20  ;;  %v5378_v20 = vld [vmem:[#allocation17 + $0x78] sm:$0xff]  }
 0x3b5   :  { %3584 = vmatprep.subr.bf16.mxu0 %v5279_v21  ;;  %v5379_v21 = vld [vmem:[#allocation17 + $0x38] sm:$0xff]  }
 0x3b8   :  { %3585 = vmatpush1.bf16.msra.mxu0 %v5277_v22  ;;  %v5757_v22 = vmov 0.0  }
 0x3b9   :  { %3586 = vmatprep.subr.bf16.mxu0 %v5282_v23  ;;  %v3659_v23 = vld [vmem:[#allocation16] sm:$0x3] }
 0x3bc   :  { %3587 = vmatpush1.bf16.msra.mxu0 %v5280_v25  ;;  %v3664_v25 = vrot.slane %v3659_v23, %v6019_v13  ;;  %v5381_v13 = vld [vmem:[#allocation20 + $0x8] sm:$0xff]  }
 0x3bd   :  { %3588 = vmatprep.subr.bf16.mxu0 %v5285_v26  ;;  %v3668_v26 = vrot.slane %v3659_v23, %v6024_v15  ;;  %v5382_v15 = vld [vmem:[#allocation20 + $0x10] sm:$0xff]  }
 0x3c0   :  { %3589 = vmatpush1.bf16.msra.mxu0 %v5283_v28 }
 0x3c1   :  { %3590 = vmatprep.subr.bf16.mxu0 %v5288_v29 }
 0x3c4   :  { %3591 = vmatpush1.bf16.msra.mxu0 %v5286_v31 }
 0x3c5   :  { %3592 = vmatprep.subr.bf16.mxu0 %v5291_v32 }
 0x3c8   :  { %3593 = vmatpush1.bf16.msra.mxu0 %v5289_v4 }
 0x3c9   :  { %3594 = vmatprep.subr.bf16.mxu0 %v5294_v33 }
 0x3cc   :  { %3595 = vmatpush1.bf16.msra.mxu0 %v5292_v14 }
 0x3cd   :  { %3596 = vmatprep.subr.bf16.mxu0 %v5297_v34 }
 0x3d0   :  { %3597 = vmatpush1.bf16.msra.mxu0 %v5295_v35 }
 0x3d1   :  { %3598 = vmatprep.subr.bf16.mxu0 %v5300_v36 }
 0x3d4   :  { %3599 = vmatpush1.bf16.msra.mxu0 %v5298_v59 }
 0x3d5   :  { %3600 = vmatprep.subr.bf16.mxu0 %v5303_v37 }
 0x3d8   :  { %3601 = vmatpush1.bf16.msra.mxu0 %v5301_v38 }
 0x3d9   :  { %3602 = vmatprep.subr.bf16.mxu0 %v5306_v39 }
 0x3dc   :  { %3603 = vmatpush1.bf16.msra.mxu0 %v5304_v40  ;;  %v5380_v40 = vld [vmem:[#allocation20] sm:$0xff]  }
 0x3dd   :  { %3604 = vmatprep.subr.bf16.mxu0 %v5309_v41  ;;  %v5383_v41 = vld [vmem:[#allocation20 + $0x18] sm:$0xff]  }
 0x3e0   :  { %3605 = vmatpush1.bf16.msra.mxu0 %v5307_v42  ;;  %v5384_v42 = vld [vmem:[#allocation20 + $0x20] sm:$0xff]  }
 0x3e1   :  { %3606 = vmatprep.subr.bf16.mxu0 %v5312_v45  ;;  %v5385_v45 = vld [vmem:[#allocation20 + $0x28] sm:$0xff]  }
 0x3e4   :  { %3607 = vmatpush1.bf16.msra.mxu0 %v5310_v46  ;;  %v5386_v46 = vld [vmem:[#allocation20 + $0x30] sm:$0xff]  }
 0x3e5   :  { %3608 = vmatprep.subr.bf16.mxu0 %v5315_v47  ;;  %v5387_v47 = vld [vmem:[#allocation20 + $0x38] sm:$0xff]  }
 0x3e8   :  { %3609 = vmatpush1.bf16.msra.mxu0 %v5313_v48 }
 0x3eb   :  { %3611 = vmatmul.mubr.bf16.vlgmr.msra.gmra.mrb[12].mxu0 %v6068_v8  ;;  %v5371_v8 = vld [vmem:[#allocation17 + $0x18] sm:$0xff]  }
 0x4be   :  { %v3612_v43 = vpop.f32.mrb[12].mxu0 }
 0x4bf   :  { %v4779_v55 = vadd.f32 %v3612_v43, %v3208_v53  ;;  %v3614_v44 = vpop.f32.mrb[13].mxu0 }
 0x4c0   :  { %v4780_v56 = vadd.f32 %v3614_v44, %v3212_v54  ;;  %v3616_v57 = vpop.f32.mrb[14].mxu0 }
 0x4c1   :  { %v4781_v27 = vadd.f32 %v3616_v57, %v3208_v53  ;;  %v3618_v58 = vpop.f32.mrb[15].mxu0  ;;  %v3621_v61 = vmax.f32 %v4779_v55, 0.0 }
 0x4c2   :  { %v4782_v60 = vadd.f32 %v3618_v58, %v3212_v54  ;;  %v3622_v30 = vmax.f32 %v4780_v56, 0.0 }
 0x4c3   :  { %v3623_v12 = vmax.f32 %v4781_v27, 0.0 }
 0x4c4   :  { %v3624_v62 = vmax.f32 %v4782_v60, 0.0 }
 0x4c5   :  { %v3625_v63 = vpack.c.bf16 %v3623_v12, %v3621_v61 }
 0x4c6   :  { %v3626_v0 = vpack.c.bf16 %v3624_v62, %v3622_v30 }
 0x4c8   :  { %3863 = vmatprep.mubr.bf16.mxu1 %v3626_v0 }
 0x4c9   :  { %3864 = vmatmul.mubr.bf16.vlgmr.msra.gmra.mrb[12].mxu1 %v3625_v63 }
 0x4ca   :  { %4721 = vmatpush3.bf16.msra.mxu1 %v5365_v1 }
 0x4cb   :  { %4722 = vmatprep.subr.bf16.mxu1 %v5366_v2 }
 0x4ce   :  { %4723 = vmatpush3.bf16.msra.mxu1 %v5367_v3 }
 0x4cf   :  { %4724 = vmatprep.subr.bf16.mxu1 %v5368_v5 }
 0x4d2   :  { %4725 = vmatpush3.bf16.msra.mxu1 %v5369_v6 }
 0x4d3   :  { %4726 = vmatprep.subr.bf16.mxu1 %v5370_v7 }
 0x4d6   :  { %4727 = vmatpush3.bf16.msra.mxu1 %v5371_v8 }
 0x4d7   :  { %4728 = vmatprep.subr.bf16.mxu1 %v5372_v9 }
 0x4da   :  { %4729 = vmatpush3.bf16.msra.mxu1 %v5373_v10 }
 0x4db   :  { %4730 = vmatprep.subr.bf16.mxu1 %v5374_v16 }
 0x4de   :  { %4731 = vmatpush3.bf16.msra.mxu1 %v5375_v17 }
 0x4df   :  { %4732 = vmatprep.subr.bf16.mxu1 %v5376_v18 }
 0x4e2   :  { %4733 = vmatpush3.bf16.msra.mxu1 %v5377_v19 }
 0x4e3   :  { %4734 = vmatprep.subr.bf16.mxu1 %v5378_v20 }
 0x4e6   :  { %4735 = vmatpush3.bf16.msra.mxu1 %v5379_v21 }
 0x4e7   :  { %4751 = vmatprep.subr.bf16.mxu1 %v5757_v22 }
 0x59c   :  { %v3865_v28 = vpop.f32.mrb[12].mxu1 }
 0x59d   :  { %v3866_v29 = vadd.f32 %v3865_v28, %v3664_v25  ;;  %v3867_v31 = vpop.f32.mrb[13].mxu1 }
 0x59e   :  { %v3868_v32 = vadd.f32 %v3867_v31, %v3668_v26  ;;  %v3869_v4 = vpop.f32.mrb[14].mxu1 }
 0x59f   :  { %v3870_v33 = vadd.f32 %v3869_v4, %v3664_v25  ;;  %v3871_v14 = vpop.f32.mrb[15].mxu1  ;;  %v3874_v35 = vmax.f32 %v3866_v29, 0.0 }
 0x5a0   :  { %v3872_v34 = vadd.f32 %v3871_v14, %v3668_v26  ;;  %v3875_v59 = vmax.f32 %v3868_v32, 0.0 }
 0x5a1   :  { %v3876_v36 = vmax.f32 %v3870_v33, 0.0 }
 0x5a2   :  { %v3877_v37 = vmax.f32 %v3872_v34, 0.0 }
 0x5a3   :  { %v3878_v38 = vpack.c.bf16 %v3876_v36, %v3874_v35 }
 0x5a4   :  { %v3879_v39 = vpack.c.bf16 %v3877_v37, %v3875_v59 }
 0x5a6   :  { %4047 = vmatprep.mubr.bf16.mxu1 %v3879_v39 }
 0x5a7   :  { %4048 = vmatmul.mubr.bf16.vlgmr.msra.gmra.mrb[16].mxu1 %v3878_v38 }
 0x5a8   :  { %4752 = vmatpush3.bf16.msra.mxu1 %v5380_v40  ;;  %4767 = vmatprep.mubr.msk.bf16.mxu1 %vm5758_vm0, %v5757_v22 }
 0x5a9   :  { %4753 = vmatprep.subr.bf16.mxu1 %v5757_v22 }
 0x5ac   :  { %4754 = vmatpush3.bf16.msra.mxu1 %v5381_v13 }
 0x5ad   :  { %4755 = vmatprep.subr.bf16.mxu1 %v5757_v22 }
 0x5b0   :  { %4756 = vmatpush3.bf16.msra.mxu1 %v5382_v15 }
 0x5b1   :  { %4757 = vmatprep.subr.bf16.mxu1 %v5757_v22 }
 0x5b4   :  { %4758 = vmatpush3.bf16.msra.mxu1 %v5383_v41 }
 0x5b5   :  { %4759 = vmatprep.subr.bf16.mxu1 %v5757_v22 }
 0x5b8   :  { %4760 = vmatpush3.bf16.msra.mxu1 %v5384_v42 }
 0x5b9   :  { %4761 = vmatprep.subr.bf16.mxu1 %v5757_v22 }
 0x5bc   :  { %4762 = vmatpush3.bf16.msra.mxu1 %v5385_v45 }
 0x5bd   :  { %4763 = vmatprep.subr.bf16.mxu1 %v5757_v22 }
 0x5c0   :  { %4764 = vmatpush3.bf16.msra.mxu1 %v5386_v46 }
 0x5c1   :  { %4765 = vmatprep.subr.bf16.mxu1 %v5757_v22 }
 0x5c4   :  { %4766 = vmatpush3.bf16.msra.mxu1 %v5387_v47 }
 0x67a   :  { %v4736_v48 = vpop.f32.mrb[16].mxu1 }
 0x67b   :  { %v4737_v50 = vpop.f32.mrb[17].mxu1 }
 0x67c   :  { %v4738_v51 = vadd.f32 %v4737_v50, %v4736_v48  ;;  %v4739_v11 = vpop.f32.mrb[18].mxu1 }
 0x67d   :  { %v4740_v24 = vpop.f32.mrb[19].mxu1 }
 0x67e   :  { %v4050_v52 = vadd.f32 %v4738_v51, %v4694_v49  ;;  %v4741_v53 = vadd.f32 %v4740_v24, %v4739_v11 }
 0x680   :  { %v4056_v54 = vmax.f32 %v4050_v52, 0.0  ;;  %v4053_v43 = vadd.f32 %v4741_v53, %v4694_v49 }
 0x682   :  { %4059 = vst [vmem:[#allocation23] sm:$0xff] %v4056_v54  ;;  %v4057_v55 = vmax.f32 %v4053_v43, 0.0 }
 0x684   :  { %v4058_v44 = vpack.c.bf16 %v4057_v55, %v4056_v54  ;;  %4060 = vst [vmem:[#allocation23 + $0x8] sm:$0xff] %v4057_v55 }
 0x686   :  { %4768 = vmatmul.mubr.bf16.vlgmr.msra.gmra.mrb[20].mxu1 %v4058_v44 }
 0x687   :  { %5685 = shalt.err (!%p5682_p10)
}
 0x688   :  { %s5686_s5 = scalar_lea.hbm %s6118_s13, 256 }
 0x689   :  { %p5687_p11 = scmp.ne.s32.totalorder %s6118_s13, %s5686_s5  ;;  %p5690_p12 = scmp.lt.u32.totalorder %s5686_s5, %s6118_s13 }
 0x68b   :  { %p5692_p13 = pnand %p5690_p12, %p5687_p11 }
 0x68d   :  { %5695 = shalt.err (!%p5692_p13)
}
 0x68e   :  { %4186 = dma.vmem_to_hbm [thread:$0]  %s4181_s17, 256, %s6118_s13, [#allocation4], %s5743_s3, %s5743_s3, %s5744_s28   ;;  %v4711_v56 = vld [vmem:[#allocation22] ss:$0 sm:$0xff] }
 0x68f   :  { %s5760_s8 = smov [#allocation24]  }
 0x690   :  { %s4192_s19 = sshll.u32 %s5760_s8, 4  ;;  %s4193_s19 = int_to_ptr.vmem [resolvable:$true] %s4192_s19 }
 0x691   :  { %s5696_s18 = scalar_lea.vmem %s4193_s19, 256  ;;  %p5701_p1 = scmp.lt.s32.totalorder %s4193_s19, %s4193_s19 }
 0x692   :  { %p5697_p0 = scmp.ne.s32.totalorder %s4193_s19, %s5696_s18  ;;  %p5702_p2 = scmp.lt.s32.totalorder %s5696_s18, %s5696_s18 }
 0x694   :  { %p5703_p3 = por %p5702_p2, %p5701_p1 }
 0x696   :  { %p5704_p4 = pnand %p5703_p3, %p5697_p0 }
 0x759   :  { %v4166_v57 = vpop.f32.mrb[20].mxu1 }
 0x75a   :  { %v4167_v27 = vadd.f32 %v4711_v56, %v4166_v57  ;;  %v4769_v58 = vpop.f32.mrb[21].mxu1 }
 0x75b   :  { %v4169_v60 = vpop.f32.mrb[22].mxu1 }
 0x75c   :  { %4173 = vst [vmem:[#allocation24] sm:$0xff] %v4167_v27  ;;  %v4170_v61 = vadd.f32 %v4711_v56, %v4169_v60  ;;  %v4770_v12 = vpop.f32.mrb[23].mxu1 }
 0x75e   :  { %4174 = vst [vmem:[#allocation24 + $0x8] sm:$0xff] %v4170_v61 }
 0x75f   :  { %5707 = shalt.err (!%p5704_p4)
}
 0x760   :  { %s5708_s25 = scalar_lea.hbm %s6119_s14, 256 }
 0x761   :  { %p5709_p5 = scmp.ne.s32.totalorder %s6119_s14, %s5708_s25  ;;  %p5712_p6 = scmp.lt.u32.totalorder %s5708_s25, %s6119_s14 }
 0x763   :  { %p5714_p7 = pnand %p5712_p6, %p5709_p5 }
 0x765   :  { %5717 = shalt.err (!%p5714_p7)
}
 0x766   :  { %4198 = dma.vmem_to_hbm [thread:$0]  %s4193_s19, 256, %s6119_s14, [#allocation25], %s5743_s3, %s5743_s3, %s5744_s28  }
 0x767   :  { %5732 = dma.done.wait [#allocation4], 256  }
 0x768   :  { %5733 = vsyncadd [#allocation4], 4294967040 }
 0x769   :  { %5734 = dma.done.wait [#allocation25], 256  }
 0x76a   :  { %5735 = vsyncadd [#allocation25], 4294967040 }
 0x76b   :  { %4205 = vsyncpa [#allocation3], 1 }
 0x76c   :  { %4206 = vsyncpa [#allocation6], 1 }
 0x76d   :  { %4207 = vsyncpa [#allocation9], 1 }
 0x76e   :  { %4208 = vsyncpa [#allocation12], 1 }
 0x76f   :  { %4209 = vsyncpa [#allocation15], 1 }
 0x770   :  { %4210 = vsyncpa [#allocation18], 1 }
 0x771   :  { %4211 = vsyncpa [#allocation21], 1 }
 0x772   :  { %4212 = vsyncpa [#allocation4], 1 }
 0x773   :  { %4213 = vsyncpa [#allocation25], 1 }

</bundles_post_ra>
